<compile_context>
chip_gen: v7x
topology: tpu7x:2x2x1
jax: 0.10.0
libtpu: 0.0.40
codegen_flags: <defaults>
</compile_context>

<pallas_src>
import functools

import jax
import jax.numpy as jnp
from jax import lax
from jax.experimental import pallas as pl
from jax.experimental.pallas import tpu as pltpu


# ----------------------------- Pallas kernel ------------------------------ #

def bilstm_kernel(pre_f_ref, pre_b_ref,           # (1, tc, Bp, 4Hp) f32 chunks
                  whh_f_ref, whh_b_ref,           # (Hp, 4Hp) bf16, resident
                  h0_ref, c0_ref,                 # (2, Bp, Hp) f32
                  hn_ref, cn_ref, hbf_ref,        # outputs
                  hf_sc, cf_sc, hb_sc, cb_sc,     # VMEM scratch carries
                  *, last_step):
    """One grid step = one time chunk; both LSTM directions interleaved.

    The backward direction's `pre` was time-reversed in the wrapper, so both
    chains walk chunks 0..nt-1 and positions 0..tc-1 with identical static
    indexing.  `last_step` is the statically-known position of the last REAL
    timestep inside the final (possibly zero-padded) chunk.
    """
    t = pl.program_id(0)
    nt = pl.num_programs(0)
    tc = pre_f_ref.shape[1]
    _, hp = hf_sc.shape
    bf16 = jnp.bfloat16

    # (re)initialize both directions' carries at the first chunk
    @pl.when(t == 0)
    def _():
        hf_sc[...] = h0_ref[0]
        cf_sc[...] = c0_ref[0]
        hb_sc[...] = h0_ref[1]
        cb_sc[...] = c0_ref[1]

    whh_f = whh_f_ref[...]                         # (hp, 4hp) bf16
    whh_b = whh_b_ref[...]
    hf, cf = hf_sc[...], cf_sc[...]                # f32 carries
    hb, cb = hb_sc[...], cb_sc[...]

    def lstm_step(pre_t, whh, h, c):
        gates = pre_t + jnp.dot(h.astype(bf16), whh,
                                preferred_element_type=jnp.float32)  # (Bp, 4hp)
        # PyTorch gate order i, f, g, o; slices are 128-lane aligned (hp % 128 == 0).
        # sigmoid(x) = 0.5*tanh(0.5*x) + 0.5: a single EUP tanh per gate.
        i_g = 0.5 * jnp.tanh(0.5 * gates[:, 0:hp]) + 0.5
        f_g = 0.5 * jnp.tanh(0.5 * gates[:, hp:2 * hp]) + 0.5
        g_g = jnp.tanh(gates[:, 2 * hp:3 * hp])
        o_g = 0.5 * jnp.tanh(0.5 * gates[:, 3 * hp:4 * hp]) + 0.5
        c_new = f_g * c + i_g * g_g
        h_new = o_g * jnp.tanh(c_new)
        return h_new, c_new

    hb_first = hb
    hf_fin, cf_fin, hb_fin, cb_fin = hf, cf, hb, cb

    # Statically unrolled over the chunk; two independent chains per step so
    # the scheduler can hide one chain's MXU/EUP latency under the other's.
    for i in range(tc):
        hf, cf = lstm_step(pre_f_ref[0, i], whh_f, hf, cf)
        hb, cb = lstm_step(pre_b_ref[0, i], whh_b, hb, cb)
        if i == 0:
            hb_first = hb            # backward hidden after its first reverse
                                     # step == lstm_out[:, -1, H:2H]
        if i == last_step:
            hf_fin, cf_fin = hf, cf  # last REAL timestep (final chunk may be padded)
            hb_fin, cb_fin = hb, cb

    hf_sc[...] = hf
    cf_sc[...] = cf
    hb_sc[...] = hb
    cb_sc[...] = cb

    @pl.when(t == 0)
    def _():
        hbf_ref[...] = hb_first

    @pl.when(t == nt - 1)
    def _():
        hn_ref[0] = hf_fin
        hn_ref[1] = hb_fin
        cn_ref[0] = cf_fin
        cn_ref[1] = cb_fin

    # TODO(synk): on v7x the two directions could instead be split across the
    # two TensorCores (grid=(2, nt), dimension_semantics=("parallel",
    # "arbitrary")); here they are interleaved on one core, which is the better
    # layout for single-TC v5e/v6e.


# ------------------------------ JAX wrapper -------------------------------- #

def _round_up(n, m):
    return ((n + m - 1) // m) * m


def _pad_gate_cols(w, H, Hp):
    """(..., 4H) -> (..., 4Hp): zero-pad each of the 4 gate blocks to Hp lanes."""
    lead = w.shape[:-1]
    w = w.reshape(lead + (4, H))
    w = jnp.pad(w, [(0, 0)] * len(lead) + [(0, 0), (0, Hp - H)])
    return w.reshape(lead + (4 * Hp,))


def sentiment_forward(X, hidden, params, *, time_chunk=8):
    """X: (B, T) int32 token ids.  hidden: (h0, c0), each (2, B, H) f32."""
    B, T = X.shape
    H = params["whh_f"].shape[0]

    Bp = _round_up(B, 8)
    Hp = _round_up(H, 128)
    G = 4 * Hp

    tc = max(1, min(time_chunk, T))
    nt = pl.cdiv(T, tc)
    Tp = nt * tc                          # pad T up instead of degrading tc
    last_step = (T - 1) % tc              # last real timestep inside final chunk

    bf16, f32 = jnp.bfloat16, jnp.float32

    # ---- pack recurrent weights (per-gate lane padding, bf16 MXU operands) ----
    wih_f = _pad_gate_cols(params["wih_f"], H, Hp).astype(bf16)            # (E, G)
    wih_b = _pad_gate_cols(params["wih_b"], H, Hp).astype(bf16)
    whh_f = _pad_gate_cols(jnp.pad(params["whh_f"], ((0, Hp - H), (0, 0))),
                           H, Hp).astype(bf16)                             # (Hp, G)
    whh_b = _pad_gate_cols(jnp.pad(params["whh_b"], ((0, Hp - H), (0, 0))),
                           H, Hp).astype(bf16)
    b_f = _pad_gate_cols(params["b_f"].reshape(4 * H), H, Hp).astype(f32)  # (G,)
    b_b = _pad_gate_cols(params["b_b"].reshape(4 * H), H, Hp).astype(f32)

    # ---- embedding gather (time-major) + hoisted input projection (XLA) ----
    emb_tab = params["embedding"].astype(bf16)
    x_tm = emb_tab[X.T]                                            # (T, B, E)
    x_tm = jnp.pad(x_tm, ((0, 0), (0, Bp - B), (0, 0)))            # (T, Bp, E)
    x_f = jnp.pad(x_tm, ((0, Tp - T), (0, 0), (0, 0)))             # pad T at end
    x_b = jnp.pad(x_tm[::-1], ((0, Tp - T), (0, 0), (0, 0)))       # time-reversed

    pre_f = (jnp.einsum("tbe,eg->tbg", x_f, wih_f,
                        preferred_element_type=f32) + b_f)         # (Tp, Bp, G) f32
    pre_b = (jnp.einsum("tbe,eg->tbg", x_b, wih_b,
                        preferred_element_type=f32) + b_b)
    pre_f = pre_f.reshape(nt, tc, Bp, G)
    pre_b = pre_b.reshape(nt, tc, Bp, G)

    h0, c0 = hidden
    h0p = jnp.pad(h0.astype(f32), ((0, 0), (0, Bp - B), (0, Hp - H)))
    c0p = jnp.pad(c0.astype(f32), ((0, 0), (0, Bp - B), (0, Hp - H)))

    chunk_map = lambda t: (t, 0, 0, 0)
    const2 = lambda t: (0, 0)
    const3 = lambda t: (0, 0, 0)

    in_specs = [
        pl.BlockSpec((1, tc, Bp, G), chunk_map),      # pre_f, streamed per chunk
        pl.BlockSpec((1, tc, Bp, G), chunk_map),      # pre_b, streamed per chunk
        pl.BlockSpec((Hp, G), const2),                # whh_f, resident
        pl.BlockSpec((Hp, G), const2),                # whh_b, resident
        pl.BlockSpec((2, Bp, Hp), const3),            # h0
        pl.BlockSpec((2, Bp, Hp), const3),            # c0
    ]
    out_specs = (
        pl.BlockSpec((2, Bp, Hp), const3),            # h_n (fwd final, bwd final)
        pl.BlockSpec((2, Bp, Hp), const3),            # c_n
        pl.BlockSpec((Bp, Hp), const2),               # bwd hidden at t = T-1
    )
    scratch = [pltpu.VMEM((Bp, Hp), f32) for _ in range(4)]   # hf, cf, hb, cb

    # exact VMEM residency (inputs double-buffered by default) + ~25% headroom
    pre_bytes = tc * Bp * G * 4
    est = (2 * 2 * pre_bytes                              # pre_f / pre_b chunks
           + 2 * 2 * Hp * G * 2                           # whh_f / whh_b (bf16)
           + 2 * 2 * 2 * Bp * Hp * 4                      # h0 / c0
           + 2 * (2 * 2 * Bp * Hp * 4) + 2 * Bp * Hp * 4  # hn / cn / hbf outputs
           + 4 * Bp * Hp * 4)                             # carry scratch
    vmem_limit = int(min(est + est // 4 + (2 << 20), 64 << 20))

    cost = pl.CostEstimate(
        flops=int(2 * Tp * 2 * Bp * Hp * G + 2 * Tp * 10 * Bp * Hp),
        transcendentals=int(2 * Tp * 5 * Bp * Hp),
        bytes_accessed=int(2 * Tp * Bp * G * 4 + 2 * Hp * G * 2
                           + 2 * 2 * Bp * Hp * 4 + 5 * Bp * Hp * 4),
    )

    hn_p, cn_p, hbf_p = pl.pallas_call(
        functools.partial(bilstm_kernel, last_step=last_step),
        out_shape=(
            jax.ShapeDtypeStruct((2, Bp, Hp), f32),
            jax.ShapeDtypeStruct((2, Bp, Hp), f32),
            jax.ShapeDtypeStruct((Bp, Hp), f32),
        ),
        grid_spec=pltpu.PrefetchScalarGridSpec(
            num_scalar_prefetch=0,
            grid=(nt,),                                  # time chunks
            in_specs=in_specs,
            out_specs=out_specs,
            scratch_shapes=scratch,
        ),
        compiler_params=pltpu.CompilerParams(
            dimension_semantics=("arbitrary",),          # carried recurrence
            vmem_limit_bytes=vmem_limit,
        ),
        cost_estimate=cost,
    )(pre_f, pre_b, whh_f, whh_b, h0p, c0p)

    hn = hn_p[:, :B, :H]
    cn = cn_p[:, :B, :H]
    h_bwd_at_last_t = hbf_p[:B, :H]                      # lstm_out[:, -1, H:2H]

    # FC head + sigmoid: trivial (B, 2H) x (2H, O) matmul, left to XLA.
    # TODO(synk): nn.Dropout(0.3) treated as identity (eval mode); add
    # pltpu stateful-PRNG masking if training-mode dropout is ever needed.
    last = jnp.concatenate([hn[0], h_bwd_at_last_t], axis=-1).astype(bf16)
    logits = (jnp.dot(last, params["fc_w"].astype(bf16),
                      preferred_element_type=f32) + params["fc_b"])
    sig_out = jnp.squeeze(jax.nn.sigmoid(logits))        # matches torch .squeeze()
    return sig_out, (hn, cn)


def init_params(key, vocab, embed_dim, hidden_dim, output_dim):
    ks = jax.random.split(key, 10)
    s = 1.0 / jnp.sqrt(hidden_dim)

    def u(k, shape):
        return jax.random.uniform(k, shape, jnp.float32, -s, s)

    return {
        "embedding": jax.random.normal(ks[0], (vocab, embed_dim), jnp.float32),
        # pre-transposed: W_ih -> (E, 4H), W_hh -> (H, 4H), bias = b_ih + b_hh
        "wih_f": u(ks[1], (embed_dim, 4 * hidden_dim)),
        "whh_f": u(ks[2], (hidden_dim, 4 * hidden_dim)),
        "b_f":   u(ks[3], (1, 4 * hidden_dim)),
        "wih_b": u(ks[4], (embed_dim, 4 * hidden_dim)),
        "whh_b": u(ks[5], (hidden_dim, 4 * hidden_dim)),
        "b_b":   u(ks[6], (1, 4 * hidden_dim)),
        "fc_w":  u(ks[7], (2 * hidden_dim, output_dim)),
        "fc_b":  u(ks[8], (1, output_dim)),
    }


# --------------------------- pure-JAX reference ---------------------------- #
# Mirrors the kernel's precision policy (bf16 matmul operands, f32 accumulation,
# f32 h/c carries) so the tolerance check is meaningful.

def _ref_forward(X, hidden, params):
    bf = jnp.bfloat16
    emb = params["embedding"].astype(bf)[X]                       # (B, T, E)
    h0, c0 = hidden
    H = params["whh_f"].shape[0]

    def mk_step(wih, whh, b):
        wih = wih.astype(bf)
        whh = whh.astype(bf)

        def step(carry, x_t):
            h, c = carry
            g = (jnp.dot(x_t, wih, preferred_element_type=jnp.float32)
                 + jnp.dot(h.astype(bf), whh, preferred_element_type=jnp.float32)
                 + b)
            i = jax.nn.sigmoid(g[:, 0:H])
            f = jax.nn.sigmoid(g[:, H:2 * H])
            gg = jnp.tanh(g[:, 2 * H:3 * H])
            o = jax.nn.sigmoid(g[:, 3 * H:4 * H])
            c = f * c + i * gg
            h = o * jnp.tanh(c)
            return (h, c), h
        return step

    xs = jnp.transpose(emb, (1, 0, 2))                            # (T, B, E)
    (h_f, c_f), _ = lax.scan(
        mk_step(params["wih_f"], params["whh_f"], params["b_f"]), (h0[0], c0[0]), xs)
    (h_b, c_b), hs_b = lax.scan(
        mk_step(params["wih_b"], params["whh_b"], params["b_b"]), (h0[1], c0[1]), xs[::-1])
    out_bwd_last = hs_b[0]                                        # backward at t = T-1
    last = jnp.concatenate([h_f, out_bwd_last], axis=-1).astype(bf)
    logits = (jnp.dot(last, params["fc_w"].astype(bf),
                      preferred_element_type=jnp.float32) + params["fc_b"])
    return (jnp.squeeze(jax.nn.sigmoid(logits)),
            (jnp.stack([h_f, h_b]), jnp.stack([c_f, c_b])))


# --------------------------------- main ------------------------------------ #

if __name__ == "__main__":
    B, T, E, H, V, OUT = 2, 10, 32, 32, 50, 1

    key = jax.random.PRNGKey(0)
    k_p, k_x, k_h, k_c = jax.random.split(key, 4)
    params = init_params(k_p, V, E, H, OUT)

    X = jax.random.randint(k_x, (B, T), 0, V, dtype=jnp.int32)
    # module's init_hidden gives zeros; use small nonzero states to also
    # exercise the h0/c0 plumbing (forward() accepts arbitrary hidden)
    hidden = (0.1 * jax.random.normal(k_h, (2, B, H), jnp.float32),
              0.1 * jax.random.normal(k_c, (2, B, H), jnp.float32))

    sig_out, (hn, cn) = sentiment_forward(X, hidden, params, time_chunk=4)
    jax.block_until_ready((sig_out, hn, cn))

    # sanity check against a pure-JAX reference with the same precision policy
    ref_sig, (ref_hn, ref_cn) = _ref_forward(X, hidden, params)
    assert jnp.allclose(sig_out, ref_sig, rtol=5e-3, atol=5e-3)
    assert jnp.allclose(hn, ref_hn, rtol=5e-3, atol=5e-3)
    assert jnp.allclose(cn, ref_cn, rtol=5e-3, atol=5e-3)

    print("KERNEL_OK")
</pallas_src>

<mosaic_0001>
module attributes {stable_mosaic.version = 11 : i64} {
  func.func @bilstm_kernel(%arg0: i32, %arg1: memref<1x4x8x512xf32, #tpu.memory_space<vmem>>, %arg2: memref<1x4x8x512xf32, #tpu.memory_space<vmem>>, %arg3: memref<128x512xbf16, #tpu.memory_space<vmem>>, %arg4: memref<128x512xbf16, #tpu.memory_space<vmem>>, %arg5: memref<2x8x128xf32, #tpu.memory_space<vmem>>, %arg6: memref<2x8x128xf32, #tpu.memory_space<vmem>>, %arg7: memref<2x8x128xf32, #tpu.memory_space<vmem>>, %arg8: memref<2x8x128xf32, #tpu.memory_space<vmem>>, %arg9: memref<8x128xf32, #tpu.memory_space<vmem>>, %arg10: memref<8x128xf32, #tpu.memory_space<vmem>>, %arg11: memref<8x128xf32, #tpu.memory_space<vmem>>, %arg12: memref<8x128xf32, #tpu.memory_space<vmem>>, %arg13: memref<8x128xf32, #tpu.memory_space<vmem>>) attributes {dimension_semantics = [#tpu.dimension_semantics<arbitrary>], iteration_bounds = array<i64: 3>, scalar_prefetch = 0 : i64, scratch_operands = 4 : i64, tpu.core_type = #tpu.core_type<tc>, window_params = [{transform_indices = @transform_0, window_bounds = array<i64: 1, 4, 8, 512>}, {transform_indices = @transform_1, window_bounds = array<i64: 1, 4, 8, 512>}, {pipeline_mode = #tpu.pipeline_mode<synchronous>, transform_indices = @transform_2, window_bounds = array<i64: 128, 512>}, {pipeline_mode = #tpu.pipeline_mode<synchronous>, transform_indices = @transform_3, window_bounds = array<i64: 128, 512>}, {pipeline_mode = #tpu.pipeline_mode<synchronous>, transform_indices = @transform_4, window_bounds = array<i64: 2, 8, 128>}, {pipeline_mode = #tpu.pipeline_mode<synchronous>, transform_indices = @transform_5, window_bounds = array<i64: 2, 8, 128>}, {pipeline_mode = #tpu.pipeline_mode<synchronous>, transform_indices = @transform_6, window_bounds = array<i64: 2, 8, 128>}, {pipeline_mode = #tpu.pipeline_mode<synchronous>, transform_indices = @transform_7, window_bounds = array<i64: 2, 8, 128>}, {pipeline_mode = #tpu.pipeline_mode<synchronous>, transform_indices = @transform_8, window_bounds = array<i64: 8, 128>}]} {
    %c0_i32 = arith.constant 0 : i32
    %0 = arith.cmpi eq, %arg0, %c0_i32 : i32
    %1 = arith.extui %0 : i1 to i32
    %c0_i32_0 = arith.constant 0 : i32
    %2 = arith.cmpi ne, %1, %c0_i32_0 : i32
    scf.if %2 {
      %c0_131 = arith.constant 0 : index
      %c0_132 = arith.constant 0 : index
      %c0_133 = arith.constant 0 : index
      %307 = vector.load %arg5[%c0_131, %c0_132, %c0_133] : memref<2x8x128xf32, #tpu.memory_space<vmem>>, vector<1x8x128xf32>
      %308 = vector.shape_cast %307 : vector<1x8x128xf32> to vector<8x128xf32>
      %c0_134 = arith.constant 0 : index
      %c0_135 = arith.constant 0 : index
      %309 = vector.load %arg10[%c0_134, %c0_135] : memref<8x128xf32, #tpu.memory_space<vmem>>, vector<8x128xf32>
      tpu.vector_store %arg10[%c0_134, %c0_135], %308 {strides = array<i32>} : memref<8x128xf32, #tpu.memory_space<vmem>>, vector<8x128xf32>,
      %c0_136 = arith.constant 0 : index
      %c0_137 = arith.constant 0 : index
      %c0_138 = arith.constant 0 : index
      %310 = vector.load %arg6[%c0_136, %c0_137, %c0_138] : memref<2x8x128xf32, #tpu.memory_space<vmem>>, vector<1x8x128xf32>
      %311 = vector.shape_cast %310 : vector<1x8x128xf32> to vector<8x128xf32>
      %c0_139 = arith.constant 0 : index
      %c0_140 = arith.constant 0 : index
      %312 = vector.load %arg11[%c0_139, %c0_140] : memref<8x128xf32, #tpu.memory_space<vmem>>, vector<8x128xf32>
      tpu.vector_store %arg11[%c0_139, %c0_140], %311 {strides = array<i32>} : memref<8x128xf32, #tpu.memory_space<vmem>>, vector<8x128xf32>,
      %c1_141 = arith.constant 1 : index
      %c0_142 = arith.constant 0 : index
      %c0_143 = arith.constant 0 : index
      %313 = vector.load %arg5[%c1_141, %c0_142, %c0_143] : memref<2x8x128xf32, #tpu.memory_space<vmem>>, vector<1x8x128xf32>
      %314 = vector.shape_cast %313 : vector<1x8x128xf32> to vector<8x128xf32>
      %c0_144 = arith.constant 0 : index
      %c0_145 = arith.constant 0 : index
      %315 = vector.load %arg12[%c0_144, %c0_145] : memref<8x128xf32, #tpu.memory_space<vmem>>, vector<8x128xf32>
      tpu.vector_store %arg12[%c0_144, %c0_145], %314 {strides = array<i32>} : memref<8x128xf32, #tpu.memory_space<vmem>>, vector<8x128xf32>,
      %c1_146 = arith.constant 1 : index
      %c0_147 = arith.constant 0 : index
      %c0_148 = arith.constant 0 : index
      %316 = vector.load %arg6[%c1_146, %c0_147, %c0_148] : memref<2x8x128xf32, #tpu.memory_space<vmem>>, vector<1x8x128xf32>
      %317 = vector.shape_cast %316 : vector<1x8x128xf32> to vector<8x128xf32>
      %c0_149 = arith.constant 0 : index
      %c0_150 = arith.constant 0 : index
      %318 = vector.load %arg13[%c0_149, %c0_150] : memref<8x128xf32, #tpu.memory_space<vmem>>, vector<8x128xf32>
      tpu.vector_store %arg13[%c0_149, %c0_150], %317 {strides = array<i32>} : memref<8x128xf32, #tpu.memory_space<vmem>>, vector<8x128xf32>,
    } else {
    }
    %c0 = arith.constant 0 : index
    %c0_1 = arith.constant 0 : index
    %3 = vector.load %arg3[%c0, %c0_1] : memref<128x512xbf16, #tpu.memory_space<vmem>>, vector<128x512xbf16>
    %c0_2 = arith.constant 0 : index
    %c0_3 = arith.constant 0 : index
    %4 = vector.load %arg4[%c0_2, %c0_3] : memref<128x512xbf16, #tpu.memory_space<vmem>>, vector<128x512xbf16>
    %c0_4 = arith.constant 0 : index
    %c0_5 = arith.constant 0 : index
    %5 = vector.load %arg10[%c0_4, %c0_5] : memref<8x128xf32, #tpu.memory_space<vmem>>, vector<8x128xf32>
    %c0_6 = arith.constant 0 : index
    %c0_7 = arith.constant 0 : index
    %6 = vector.load %arg11[%c0_6, %c0_7] : memref<8x128xf32, #tpu.memory_space<vmem>>, vector<8x128xf32>
    %c0_8 = arith.constant 0 : index
    %c0_9 = arith.constant 0 : index
    %7 = vector.load %arg12[%c0_8, %c0_9] : memref<8x128xf32, #tpu.memory_space<vmem>>, vector<8x128xf32>
    %c0_10 = arith.constant 0 : index
    %c0_11 = arith.constant 0 : index
    %8 = vector.load %arg13[%c0_10, %c0_11] : memref<8x128xf32, #tpu.memory_space<vmem>>, vector<8x128xf32>
    %c0_12 = arith.constant 0 : index
    %c0_13 = arith.constant 0 : index
    %c0_14 = arith.constant 0 : index
    %c0_15 = arith.constant 0 : index
    %9 = vector.load %arg1[%c0_12, %c0_13, %c0_14, %c0_15] : memref<1x4x8x512xf32, #tpu.memory_space<vmem>>, vector<1x1x8x512xf32>
    %10 = vector.shape_cast %9 : vector<1x1x8x512xf32> to vector<8x512xf32>
    %11 = arith.truncf %5 : vector<8x128xf32> to vector<8x128xbf16>
    %cst = arith.constant dense<0.000000e+00> : vector<8x512xf32>
    %12 = tpu.matmul %11, %3, %cst {dimension_numbers = #tpu.dot_dimension_numbers<[1], [0], [0], [1], [0, 0, 1, 1], [], []>} : vector<8x128xbf16>, vector<128x512xbf16>, vector<8x512xf32> -> vector<8x512xf32>
    %13 = arith.addf %10, %12 : vector<8x512xf32>
    %14 = vector.extract_strided_slice %13 {offsets = [0, 0], sizes = [8, 128], strides = [1, 1]} : vector<8x512xf32> to vector<8x128xf32>
    %cst_16 = arith.constant 5.000000e-01 : f32
    %15 = vector.broadcast %cst_16 : f32 to vector<8x128xf32>
    %16 = arith.mulf %15, %14 : vector<8x128xf32>
    %17 = math.tanh %16 : vector<8x128xf32>
    %cst_17 = arith.constant 5.000000e-01 : f32
    %18 = vector.broadcast %cst_17 : f32 to vector<8x128xf32>
    %19 = arith.mulf %18, %17 : vector<8x128xf32>
    %cst_18 = arith.constant 5.000000e-01 : f32
    %20 = vector.broadcast %cst_18 : f32 to vector<8x128xf32>
    %21 = arith.addf %19, %20 : vector<8x128xf32>
    %22 = vector.extract_strided_slice %13 {offsets = [0, 128], sizes = [8, 128], strides = [1, 1]} : vector<8x512xf32> to vector<8x128xf32>
    %cst_19 = arith.constant 5.000000e-01 : f32
    %23 = vector.broadcast %cst_19 : f32 to vector<8x128xf32>
    %24 = arith.mulf %23, %22 : vector<8x128xf32>
    %25 = math.tanh %24 : vector<8x128xf32>
    %cst_20 = arith.constant 5.000000e-01 : f32
    %26 = vector.broadcast %cst_20 : f32 to vector<8x128xf32>
    %27 = arith.mulf %26, %25 : vector<8x128xf32>
    %cst_21 = arith.constant 5.000000e-01 : f32
    %28 = vector.broadcast %cst_21 : f32 to vector<8x128xf32>
    %29 = arith.addf %27, %28 : vector<8x128xf32>
    %30 = vector.extract_strided_slice %13 {offsets = [0, 256], sizes = [8, 128], strides = [1, 1]} : vector<8x512xf32> to vector<8x128xf32>
    %31 = math.tanh %30 : vector<8x128xf32>
    %32 = vector.extract_strided_slice %13 {offsets = [0, 384], sizes = [8, 128], strides = [1, 1]} : vector<8x512xf32> to vector<8x128xf32>
    %cst_22 = arith.constant 5.000000e-01 : f32
    %33 = vector.broadcast %cst_22 : f32 to vector<8x128xf32>
    %34 = arith.mulf %33, %32 : vector<8x128xf32>
    %35 = math.tanh %34 : vector<8x128xf32>
    %cst_23 = arith.constant 5.000000e-01 : f32
    %36 = vector.broadcast %cst_23 : f32 to vector<8x128xf32>
    %37 = arith.mulf %36, %35 : vector<8x128xf32>
    %cst_24 = arith.constant 5.000000e-01 : f32
    %38 = vector.broadcast %cst_24 : f32 to vector<8x128xf32>
    %39 = arith.addf %37, %38 : vector<8x128xf32>
    %40 = arith.mulf %29, %6 : vector<8x128xf32>
    %41 = arith.mulf %21, %31 : vector<8x128xf32>
    %42 = arith.addf %40, %41 : vector<8x128xf32>
    %43 = math.tanh %42 : vector<8x128xf32>
    %44 = arith.mulf %39, %43 : vector<8x128xf32>
    %c0_25 = arith.constant 0 : index
    %c0_26 = arith.constant 0 : index
    %c0_27 = arith.constant 0 : index
    %c0_28 = arith.constant 0 : index
    %45 = vector.load %arg2[%c0_25, %c0_26, %c0_27, %c0_28] : memref<1x4x8x512xf32, #tpu.memory_space<vmem>>, vector<1x1x8x512xf32>
    %46 = vector.shape_cast %45 : vector<1x1x8x512xf32> to vector<8x512xf32>
    %47 = arith.truncf %7 : vector<8x128xf32> to vector<8x128xbf16>
    %cst_29 = arith.constant dense<0.000000e+00> : vector<8x512xf32>
    %48 = tpu.matmul %47, %4, %cst_29 {dimension_numbers = #tpu.dot_dimension_numbers<[1], [0], [0], [1], [0, 0, 1, 1], [], []>} : vector<8x128xbf16>, vector<128x512xbf16>, vector<8x512xf32> -> vector<8x512xf32>
    %49 = arith.addf %46, %48 : vector<8x512xf32>
    %50 = vector.extract_strided_slice %49 {offsets = [0, 0], sizes = [8, 128], strides = [1, 1]} : vector<8x512xf32> to vector<8x128xf32>
    %cst_30 = arith.constant 5.000000e-01 : f32
    %51 = vector.broadcast %cst_30 : f32 to vector<8x128xf32>
    %52 = arith.mulf %51, %50 : vector<8x128xf32>
    %53 = math.tanh %52 : vector<8x128xf32>
    %cst_31 = arith.constant 5.000000e-01 : f32
    %54 = vector.broadcast %cst_31 : f32 to vector<8x128xf32>
    %55 = arith.mulf %54, %53 : vector<8x128xf32>
    %cst_32 = arith.constant 5.000000e-01 : f32
    %56 = vector.broadcast %cst_32 : f32 to vector<8x128xf32>
    %57 = arith.addf %55, %56 : vector<8x128xf32>
    %58 = vector.extract_strided_slice %49 {offsets = [0, 128], sizes = [8, 128], strides = [1, 1]} : vector<8x512xf32> to vector<8x128xf32>
    %cst_33 = arith.constant 5.000000e-01 : f32
    %59 = vector.broadcast %cst_33 : f32 to vector<8x128xf32>
    %60 = arith.mulf %59, %58 : vector<8x128xf32>
    %61 = math.tanh %60 : vector<8x128xf32>
    %cst_34 = arith.constant 5.000000e-01 : f32
    %62 = vector.broadcast %cst_34 : f32 to vector<8x128xf32>
    %63 = arith.mulf %62, %61 : vector<8x128xf32>
    %cst_35 = arith.constant 5.000000e-01 : f32
    %64 = vector.broadcast %cst_35 : f32 to vector<8x128xf32>
    %65 = arith.addf %63, %64 : vector<8x128xf32>
    %66 = vector.extract_strided_slice %49 {offsets = [0, 256], sizes = [8, 128], strides = [1, 1]} : vector<8x512xf32> to vector<8x128xf32>
    %67 = math.tanh %66 : vector<8x128xf32>
    %68 = vector.extract_strided_slice %49 {offsets = [0, 384], sizes = [8, 128], strides = [1, 1]} : vector<8x512xf32> to vector<8x128xf32>
    %cst_36 = arith.constant 5.000000e-01 : f32
    %69 = vector.broadcast %cst_36 : f32 to vector<8x128xf32>
    %70 = arith.mulf %69, %68 : vector<8x128xf32>
    %71 = math.tanh %70 : vector<8x128xf32>
    %cst_37 = arith.constant 5.000000e-01 : f32
    %72 = vector.broadcast %cst_37 : f32 to vector<8x128xf32>
    %73 = arith.mulf %72, %71 : vector<8x128xf32>
    %cst_38 = arith.constant 5.000000e-01 : f32
    %74 = vector.broadcast %cst_38 : f32 to vector<8x128xf32>
    %75 = arith.addf %73, %74 : vector<8x128xf32>
    %76 = arith.mulf %65, %8 : vector<8x128xf32>
    %77 = arith.mulf %57, %67 : vector<8x128xf32>
    %78 = arith.addf %76, %77 : vector<8x128xf32>
    %79 = math.tanh %78 : vector<8x128xf32>
    %80 = arith.mulf %75, %79 : vector<8x128xf32>
    %c0_39 = arith.constant 0 : index
    %c1 = arith.constant 1 : index
    %c0_40 = arith.constant 0 : index
    %c0_41 = arith.constant 0 : index
    %81 = vector.load %arg1[%c0_39, %c1, %c0_40, %c0_41] : memref<1x4x8x512xf32, #tpu.memory_space<vmem>>, vector<1x1x8x512xf32>
    %82 = vector.shape_cast %81 : vector<1x1x8x512xf32> to vector<8x512xf32>
    %83 = arith.truncf %44 : vector<8x128xf32> to vector<8x128xbf16>
    %cst_42 = arith.constant dense<0.000000e+00> : vector<8x512xf32>
    %84 = tpu.matmul %83, %3, %cst_42 {dimension_numbers = #tpu.dot_dimension_numbers<[1], [0], [0], [1], [0, 0, 1, 1], [], []>} : vector<8x128xbf16>, vector<128x512xbf16>, vector<8x512xf32> -> vector<8x512xf32>
    %85 = arith.addf %82, %84 : vector<8x512xf32>
    %86 = vector.extract_strided_slice %85 {offsets = [0, 0], sizes = [8, 128], strides = [1, 1]} : vector<8x512xf32> to vector<8x128xf32>
    %cst_43 = arith.constant 5.000000e-01 : f32
    %87 = vector.broadcast %cst_43 : f32 to vector<8x128xf32>
    %88 = arith.mulf %87, %86 : vector<8x128xf32>
    %89 = math.tanh %88 : vector<8x128xf32>
    %cst_44 = arith.constant 5.000000e-01 : f32
    %90 = vector.broadcast %cst_44 : f32 to vector<8x128xf32>
    %91 = arith.mulf %90, %89 : vector<8x128xf32>
    %cst_45 = arith.constant 5.000000e-01 : f32
    %92 = vector.broadcast %cst_45 : f32 to vector<8x128xf32>
    %93 = arith.addf %91, %92 : vector<8x128xf32>
    %94 = vector.extract_strided_slice %85 {offsets = [0, 128], sizes = [8, 128], strides = [1, 1]} : vector<8x512xf32> to vector<8x128xf32>
    %cst_46 = arith.constant 5.000000e-01 : f32
    %95 = vector.broadcast %cst_46 : f32 to vector<8x128xf32>
    %96 = arith.mulf %95, %94 : vector<8x128xf32>
    %97 = math.tanh %96 : vector<8x128xf32>
    %cst_47 = arith.constant 5.000000e-01 : f32
    %98 = vector.broadcast %cst_47 : f32 to vector<8x128xf32>
    %99 = arith.mulf %98, %97 : vector<8x128xf32>
    %cst_48 = arith.constant 5.000000e-01 : f32
    %100 = vector.broadcast %cst_48 : f32 to vector<8x128xf32>
    %101 = arith.addf %99, %100 : vector<8x128xf32>
    %102 = vector.extract_strided_slice %85 {offsets = [0, 256], sizes = [8, 128], strides = [1, 1]} : vector<8x512xf32> to vector<8x128xf32>
    %103 = math.tanh %102 : vector<8x128xf32>
    %104 = vector.extract_strided_slice %85 {offsets = [0, 384], sizes = [8, 128], strides = [1, 1]} : vector<8x512xf32> to vector<8x128xf32>
    %cst_49 = arith.constant 5.000000e-01 : f32
    %105 = vector.broadcast %cst_49 : f32 to vector<8x128xf32>
    %106 = arith.mulf %105, %104 : vector<8x128xf32>
    %107 = math.tanh %106 : vector<8x128xf32>
    %cst_50 = arith.constant 5.000000e-01 : f32
    %108 = vector.broadcast %cst_50 : f32 to vector<8x128xf32>
    %109 = arith.mulf %108, %107 : vector<8x128xf32>
    %cst_51 = arith.constant 5.000000e-01 : f32
    %110 = vector.broadcast %cst_51 : f32 to vector<8x128xf32>
    %111 = arith.addf %109, %110 : vector<8x128xf32>
    %112 = arith.mulf %101, %42 : vector<8x128xf32>
    %113 = arith.mulf %93, %103 : vector<8x128xf32>
    %114 = arith.addf %112, %113 : vector<8x128xf32>
    %115 = math.tanh %114 : vector<8x128xf32>
    %116 = arith.mulf %111, %115 : vector<8x128xf32>
    %c0_52 = arith.constant 0 : index
    %c1_53 = arith.constant 1 : index
    %c0_54 = arith.constant 0 : index
    %c0_55 = arith.constant 0 : index
    %117 = vector.load %arg2[%c0_52, %c1_53, %c0_54, %c0_55] : memref<1x4x8x512xf32, #tpu.memory_space<vmem>>, vector<1x1x8x512xf32>
    %118 = vector.shape_cast %117 : vector<1x1x8x512xf32> to vector<8x512xf32>
    %119 = arith.truncf %80 : vector<8x128xf32> to vector<8x128xbf16>
    %cst_56 = arith.constant dense<0.000000e+00> : vector<8x512xf32>
    %120 = tpu.matmul %119, %4, %cst_56 {dimension_numbers = #tpu.dot_dimension_numbers<[1], [0], [0], [1], [0, 0, 1, 1], [], []>} : vector<8x128xbf16>, vector<128x512xbf16>, vector<8x512xf32> -> vector<8x512xf32>
    %121 = arith.addf %118, %120 : vector<8x512xf32>
    %122 = vector.extract_strided_slice %121 {offsets = [0, 0], sizes = [8, 128], strides = [1, 1]} : vector<8x512xf32> to vector<8x128xf32>
    %cst_57 = arith.constant 5.000000e-01 : f32
    %123 = vector.broadcast %cst_57 : f32 to vector<8x128xf32>
    %124 = arith.mulf %123, %122 : vector<8x128xf32>
    %125 = math.tanh %124 : vector<8x128xf32>
    %cst_58 = arith.constant 5.000000e-01 : f32
    %126 = vector.broadcast %cst_58 : f32 to vector<8x128xf32>
    %127 = arith.mulf %126, %125 : vector<8x128xf32>
    %cst_59 = arith.constant 5.000000e-01 : f32
    %128 = vector.broadcast %cst_59 : f32 to vector<8x128xf32>
    %129 = arith.addf %127, %128 : vector<8x128xf32>
    %130 = vector.extract_strided_slice %121 {offsets = [0, 128], sizes = [8, 128], strides = [1, 1]} : vector<8x512xf32> to vector<8x128xf32>
    %cst_60 = arith.constant 5.000000e-01 : f32
    %131 = vector.broadcast %cst_60 : f32 to vector<8x128xf32>
    %132 = arith.mulf %131, %130 : vector<8x128xf32>
    %133 = math.tanh %132 : vector<8x128xf32>
    %cst_61 = arith.constant 5.000000e-01 : f32
    %134 = vector.broadcast %cst_61 : f32 to vector<8x128xf32>
    %135 = arith.mulf %134, %133 : vector<8x128xf32>
    %cst_62 = arith.constant 5.000000e-01 : f32
    %136 = vector.broadcast %cst_62 : f32 to vector<8x128xf32>
    %137 = arith.addf %135, %136 : vector<8x128xf32>
    %138 = vector.extract_strided_slice %121 {offsets = [0, 256], sizes = [8, 128], strides = [1, 1]} : vector<8x512xf32> to vector<8x128xf32>
    %139 = math.tanh %138 : vector<8x128xf32>
    %140 = vector.extract_strided_slice %121 {offsets = [0, 384], sizes = [8, 128], strides = [1, 1]} : vector<8x512xf32> to vector<8x128xf32>
    %cst_63 = arith.constant 5.000000e-01 : f32
    %141 = vector.broadcast %cst_63 : f32 to vector<8x128xf32>
    %142 = arith.mulf %141, %140 : vector<8x128xf32>
    %143 = math.tanh %142 : vector<8x128xf32>
    %cst_64 = arith.constant 5.000000e-01 : f32
    %144 = vector.broadcast %cst_64 : f32 to vector<8x128xf32>
    %145 = arith.mulf %144, %143 : vector<8x128xf32>
    %cst_65 = arith.constant 5.000000e-01 : f32
    %146 = vector.broadcast %cst_65 : f32 to vector<8x128xf32>
    %147 = arith.addf %145, %146 : vector<8x128xf32>
    %148 = arith.mulf %137, %78 : vector<8x128xf32>
    %149 = arith.mulf %129, %139 : vector<8x128xf32>
    %150 = arith.addf %148, %149 : vector<8x128xf32>
    %151 = math.tanh %150 : vector<8x128xf32>
    %152 = arith.mulf %147, %151 : vector<8x128xf32>
    %c0_66 = arith.constant 0 : index
    %c2 = arith.constant 2 : index
    %c0_67 = arith.constant 0 : index
    %c0_68 = arith.constant 0 : index
    %153 = vector.load %arg1[%c0_66, %c2, %c0_67, %c0_68] : memref<1x4x8x512xf32, #tpu.memory_space<vmem>>, vector<1x1x8x512xf32>
    %154 = vector.shape_cast %153 : vector<1x1x8x512xf32> to vector<8x512xf32>
    %155 = arith.truncf %116 : vector<8x128xf32> to vector<8x128xbf16>
    %cst_69 = arith.constant dense<0.000000e+00> : vector<8x512xf32>
    %156 = tpu.matmul %155, %3, %cst_69 {dimension_numbers = #tpu.dot_dimension_numbers<[1], [0], [0], [1], [0, 0, 1, 1], [], []>} : vector<8x128xbf16>, vector<128x512xbf16>, vector<8x512xf32> -> vector<8x512xf32>
    %157 = arith.addf %154, %156 : vector<8x512xf32>
    %158 = vector.extract_strided_slice %157 {offsets = [0, 0], sizes = [8, 128], strides = [1, 1]} : vector<8x512xf32> to vector<8x128xf32>
    %cst_70 = arith.constant 5.000000e-01 : f32
    %159 = vector.broadcast %cst_70 : f32 to vector<8x128xf32>
    %160 = arith.mulf %159, %158 : vector<8x128xf32>
    %161 = math.tanh %160 : vector<8x128xf32>
    %cst_71 = arith.constant 5.000000e-01 : f32
    %162 = vector.broadcast %cst_71 : f32 to vector<8x128xf32>
    %163 = arith.mulf %162, %161 : vector<8x128xf32>
    %cst_72 = arith.constant 5.000000e-01 : f32
    %164 = vector.broadcast %cst_72 : f32 to vector<8x128xf32>
    %165 = arith.addf %163, %164 : vector<8x128xf32>
    %166 = vector.extract_strided_slice %157 {offsets = [0, 128], sizes = [8, 128], strides = [1, 1]} : vector<8x512xf32> to vector<8x128xf32>
    %cst_73 = arith.constant 5.000000e-01 : f32
    %167 = vector.broadcast %cst_73 : f32 to vector<8x128xf32>
    %168 = arith.mulf %167, %166 : vector<8x128xf32>
    %169 = math.tanh %168 : vector<8x128xf32>
    %cst_74 = arith.constant 5.000000e-01 : f32
    %170 = vector.broadcast %cst_74 : f32 to vector<8x128xf32>
    %171 = arith.mulf %170, %169 : vector<8x128xf32>
    %cst_75 = arith.constant 5.000000e-01 : f32
    %172 = vector.broadcast %cst_75 : f32 to vector<8x128xf32>
    %173 = arith.addf %171, %172 : vector<8x128xf32>
    %174 = vector.extract_strided_slice %157 {offsets = [0, 256], sizes = [8, 128], strides = [1, 1]} : vector<8x512xf32> to vector<8x128xf32>
    %175 = math.tanh %174 : vector<8x128xf32>
    %176 = vector.extract_strided_slice %157 {offsets = [0, 384], sizes = [8, 128], strides = [1, 1]} : vector<8x512xf32> to vector<8x128xf32>
    %cst_76 = arith.constant 5.000000e-01 : f32
    %177 = vector.broadcast %cst_76 : f32 to vector<8x128xf32>
    %178 = arith.mulf %177, %176 : vector<8x128xf32>
    %179 = math.tanh %178 : vector<8x128xf32>
    %cst_77 = arith.constant 5.000000e-01 : f32
    %180 = vector.broadcast %cst_77 : f32 to vector<8x128xf32>
    %181 = arith.mulf %180, %179 : vector<8x128xf32>
    %cst_78 = arith.constant 5.000000e-01 : f32
    %182 = vector.broadcast %cst_78 : f32 to vector<8x128xf32>
    %183 = arith.addf %181, %182 : vector<8x128xf32>
    %184 = arith.mulf %173, %114 : vector<8x128xf32>
    %185 = arith.mulf %165, %175 : vector<8x128xf32>
    %186 = arith.addf %184, %185 : vector<8x128xf32>
    %187 = math.tanh %186 : vector<8x128xf32>
    %188 = arith.mulf %183, %187 : vector<8x128xf32>
    %c0_79 = arith.constant 0 : index
    %c2_80 = arith.constant 2 : index
    %c0_81 = arith.constant 0 : index
    %c0_82 = arith.constant 0 : index
    %189 = vector.load %arg2[%c0_79, %c2_80, %c0_81, %c0_82] : memref<1x4x8x512xf32, #tpu.memory_space<vmem>>, vector<1x1x8x512xf32>
    %190 = vector.shape_cast %189 : vector<1x1x8x512xf32> to vector<8x512xf32>
    %191 = arith.truncf %152 : vector<8x128xf32> to vector<8x128xbf16>
    %cst_83 = arith.constant dense<0.000000e+00> : vector<8x512xf32>
    %192 = tpu.matmul %191, %4, %cst_83 {dimension_numbers = #tpu.dot_dimension_numbers<[1], [0], [0], [1], [0, 0, 1, 1], [], []>} : vector<8x128xbf16>, vector<128x512xbf16>, vector<8x512xf32> -> vector<8x512xf32>
    %193 = arith.addf %190, %192 : vector<8x512xf32>
    %194 = vector.extract_strided_slice %193 {offsets = [0, 0], sizes = [8, 128], strides = [1, 1]} : vector<8x512xf32> to vector<8x128xf32>
    %cst_84 = arith.constant 5.000000e-01 : f32
    %195 = vector.broadcast %cst_84 : f32 to vector<8x128xf32>
    %196 = arith.mulf %195, %194 : vector<8x128xf32>
    %197 = math.tanh %196 : vector<8x128xf32>
    %cst_85 = arith.constant 5.000000e-01 : f32
    %198 = vector.broadcast %cst_85 : f32 to vector<8x128xf32>
    %199 = arith.mulf %198, %197 : vector<8x128xf32>
    %cst_86 = arith.constant 5.000000e-01 : f32
    %200 = vector.broadcast %cst_86 : f32 to vector<8x128xf32>
    %201 = arith.addf %199, %200 : vector<8x128xf32>
    %202 = vector.extract_strided_slice %193 {offsets = [0, 128], sizes = [8, 128], strides = [1, 1]} : vector<8x512xf32> to vector<8x128xf32>
    %cst_87 = arith.constant 5.000000e-01 : f32
    %203 = vector.broadcast %cst_87 : f32 to vector<8x128xf32>
    %204 = arith.mulf %203, %202 : vector<8x128xf32>
    %205 = math.tanh %204 : vector<8x128xf32>
    %cst_88 = arith.constant 5.000000e-01 : f32
    %206 = vector.broadcast %cst_88 : f32 to vector<8x128xf32>
    %207 = arith.mulf %206, %205 : vector<8x128xf32>
    %cst_89 = arith.constant 5.000000e-01 : f32
    %208 = vector.broadcast %cst_89 : f32 to vector<8x128xf32>
    %209 = arith.addf %207, %208 : vector<8x128xf32>
    %210 = vector.extract_strided_slice %193 {offsets = [0, 256], sizes = [8, 128], strides = [1, 1]} : vector<8x512xf32> to vector<8x128xf32>
    %211 = math.tanh %210 : vector<8x128xf32>
    %212 = vector.extract_strided_slice %193 {offsets = [0, 384], sizes = [8, 128], strides = [1, 1]} : vector<8x512xf32> to vector<8x128xf32>
    %cst_90 = arith.constant 5.000000e-01 : f32
    %213 = vector.broadcast %cst_90 : f32 to vector<8x128xf32>
    %214 = arith.mulf %213, %212 : vector<8x128xf32>
    %215 = math.tanh %214 : vector<8x128xf32>
    %cst_91 = arith.constant 5.000000e-01 : f32
    %216 = vector.broadcast %cst_91 : f32 to vector<8x128xf32>
    %217 = arith.mulf %216, %215 : vector<8x128xf32>
    %cst_92 = arith.constant 5.000000e-01 : f32
    %218 = vector.broadcast %cst_92 : f32 to vector<8x128xf32>
    %219 = arith.addf %217, %218 : vector<8x128xf32>
    %220 = arith.mulf %209, %150 : vector<8x128xf32>
    %221 = arith.mulf %201, %211 : vector<8x128xf32>
    %222 = arith.addf %220, %221 : vector<8x128xf32>
    %223 = math.tanh %222 : vector<8x128xf32>
    %224 = arith.mulf %219, %223 : vector<8x128xf32>
    %c0_93 = arith.constant 0 : index
    %c3 = arith.constant 3 : index
    %c0_94 = arith.constant 0 : index
    %c0_95 = arith.constant 0 : index
    %225 = vector.load %arg1[%c0_93, %c3, %c0_94, %c0_95] : memref<1x4x8x512xf32, #tpu.memory_space<vmem>>, vector<1x1x8x512xf32>
    %226 = vector.shape_cast %225 : vector<1x1x8x512xf32> to vector<8x512xf32>
    %227 = arith.truncf %188 : vector<8x128xf32> to vector<8x128xbf16>
    %cst_96 = arith.constant dense<0.000000e+00> : vector<8x512xf32>
    %228 = tpu.matmul %227, %3, %cst_96 {dimension_numbers = #tpu.dot_dimension_numbers<[1], [0], [0], [1], [0, 0, 1, 1], [], []>} : vector<8x128xbf16>, vector<128x512xbf16>, vector<8x512xf32> -> vector<8x512xf32>
    %229 = arith.addf %226, %228 : vector<8x512xf32>
    %230 = vector.extract_strided_slice %229 {offsets = [0, 0], sizes = [8, 128], strides = [1, 1]} : vector<8x512xf32> to vector<8x128xf32>
    %cst_97 = arith.constant 5.000000e-01 : f32
    %231 = vector.broadcast %cst_97 : f32 to vector<8x128xf32>
    %232 = arith.mulf %231, %230 : vector<8x128xf32>
    %233 = math.tanh %232 : vector<8x128xf32>
    %cst_98 = arith.constant 5.000000e-01 : f32
    %234 = vector.broadcast %cst_98 : f32 to vector<8x128xf32>
    %235 = arith.mulf %234, %233 : vector<8x128xf32>
    %cst_99 = arith.constant 5.000000e-01 : f32
    %236 = vector.broadcast %cst_99 : f32 to vector<8x128xf32>
    %237 = arith.addf %235, %236 : vector<8x128xf32>
    %238 = vector.extract_strided_slice %229 {offsets = [0, 128], sizes = [8, 128], strides = [1, 1]} : vector<8x512xf32> to vector<8x128xf32>
    %cst_100 = arith.constant 5.000000e-01 : f32
    %239 = vector.broadcast %cst_100 : f32 to vector<8x128xf32>
    %240 = arith.mulf %239, %238 : vector<8x128xf32>
    %241 = math.tanh %240 : vector<8x128xf32>
    %cst_101 = arith.constant 5.000000e-01 : f32
    %242 = vector.broadcast %cst_101 : f32 to vector<8x128xf32>
    %243 = arith.mulf %242, %241 : vector<8x128xf32>
    %cst_102 = arith.constant 5.000000e-01 : f32
    %244 = vector.broadcast %cst_102 : f32 to vector<8x128xf32>
    %245 = arith.addf %243, %244 : vector<8x128xf32>
    %246 = vector.extract_strided_slice %229 {offsets = [0, 256], sizes = [8, 128], strides = [1, 1]} : vector<8x512xf32> to vector<8x128xf32>
    %247 = math.tanh %246 : vector<8x128xf32>
    %248 = vector.extract_strided_slice %229 {offsets = [0, 384], sizes = [8, 128], strides = [1, 1]} : vector<8x512xf32> to vector<8x128xf32>
    %cst_103 = arith.constant 5.000000e-01 : f32
    %249 = vector.broadcast %cst_103 : f32 to vector<8x128xf32>
    %250 = arith.mulf %249, %248 : vector<8x128xf32>
    %251 = math.tanh %250 : vector<8x128xf32>
    %cst_104 = arith.constant 5.000000e-01 : f32
    %252 = vector.broadcast %cst_104 : f32 to vector<8x128xf32>
    %253 = arith.mulf %252, %251 : vector<8x128xf32>
    %cst_105 = arith.constant 5.000000e-01 : f32
    %254 = vector.broadcast %cst_105 : f32 to vector<8x128xf32>
    %255 = arith.addf %253, %254 : vector<8x128xf32>
    %256 = arith.mulf %245, %186 : vector<8x128xf32>
    %257 = arith.mulf %237, %247 : vector<8x128xf32>
    %258 = arith.addf %256, %257 : vector<8x128xf32>
    %259 = math.tanh %258 : vector<8x128xf32>
    %260 = arith.mulf %255, %259 : vector<8x128xf32>
    %c0_106 = arith.constant 0 : index
    %c3_107 = arith.constant 3 : index
    %c0_108 = arith.constant 0 : index
    %c0_109 = arith.constant 0 : index
    %261 = vector.load %arg2[%c0_106, %c3_107, %c0_108, %c0_109] : memref<1x4x8x512xf32, #tpu.memory_space<vmem>>, vector<1x1x8x512xf32>
    %262 = vector.shape_cast %261 : vector<1x1x8x512xf32> to vector<8x512xf32>
    %263 = arith.truncf %224 : vector<8x128xf32> to vector<8x128xbf16>
    %cst_110 = arith.constant dense<0.000000e+00> : vector<8x512xf32>
    %264 = tpu.matmul %263, %4, %cst_110 {dimension_numbers = #tpu.dot_dimension_numbers<[1], [0], [0], [1], [0, 0, 1, 1], [], []>} : vector<8x128xbf16>, vector<128x512xbf16>, vector<8x512xf32> -> vector<8x512xf32>
    %265 = arith.addf %262, %264 : vector<8x512xf32>
    %266 = vector.extract_strided_slice %265 {offsets = [0, 0], sizes = [8, 128], strides = [1, 1]} : vector<8x512xf32> to vector<8x128xf32>
    %cst_111 = arith.constant 5.000000e-01 : f32
    %267 = vector.broadcast %cst_111 : f32 to vector<8x128xf32>
    %268 = arith.mulf %267, %266 : vector<8x128xf32>
    %269 = math.tanh %268 : vector<8x128xf32>
    %cst_112 = arith.constant 5.000000e-01 : f32
    %270 = vector.broadcast %cst_112 : f32 to vector<8x128xf32>
    %271 = arith.mulf %270, %269 : vector<8x128xf32>
    %cst_113 = arith.constant 5.000000e-01 : f32
    %272 = vector.broadcast %cst_113 : f32 to vector<8x128xf32>
    %273 = arith.addf %271, %272 : vector<8x128xf32>
    %274 = vector.extract_strided_slice %265 {offsets = [0, 128], sizes = [8, 128], strides = [1, 1]} : vector<8x512xf32> to vector<8x128xf32>
    %cst_114 = arith.constant 5.000000e-01 : f32
    %275 = vector.broadcast %cst_114 : f32 to vector<8x128xf32>
    %276 = arith.mulf %275, %274 : vector<8x128xf32>
    %277 = math.tanh %276 : vector<8x128xf32>
    %cst_115 = arith.constant 5.000000e-01 : f32
    %278 = vector.broadcast %cst_115 : f32 to vector<8x128xf32>
    %279 = arith.mulf %278, %277 : vector<8x128xf32>
    %cst_116 = arith.constant 5.000000e-01 : f32
    %280 = vector.broadcast %cst_116 : f32 to vector<8x128xf32>
    %281 = arith.addf %279, %280 : vector<8x128xf32>
    %282 = vector.extract_strided_slice %265 {offsets = [0, 256], sizes = [8, 128], strides = [1, 1]} : vector<8x512xf32> to vector<8x128xf32>
    %283 = math.tanh %282 : vector<8x128xf32>
    %284 = vector.extract_strided_slice %265 {offsets = [0, 384], sizes = [8, 128], strides = [1, 1]} : vector<8x512xf32> to vector<8x128xf32>
    %cst_117 = arith.constant 5.000000e-01 : f32
    %285 = vector.broadcast %cst_117 : f32 to vector<8x128xf32>
    %286 = arith.mulf %285, %284 : vector<8x128xf32>
    %287 = math.tanh %286 : vector<8x128xf32>
    %cst_118 = arith.constant 5.000000e-01 : f32
    %288 = vector.broadcast %cst_118 : f32 to vector<8x128xf32>
    %289 = arith.mulf %288, %287 : vector<8x128xf32>
    %cst_119 = arith.constant 5.000000e-01 : f32
    %290 = vector.broadcast %cst_119 : f32 to vector<8x128xf32>
    %291 = arith.addf %289, %290 : vector<8x128xf32>
    %292 = arith.mulf %281, %222 : vector<8x128xf32>
    %293 = arith.mulf %273, %283 : vector<8x128xf32>
    %294 = arith.addf %292, %293 : vector<8x128xf32>
    %295 = math.tanh %294 : vector<8x128xf32>
    %296 = arith.mulf %291, %295 : vector<8x128xf32>
    %c0_120 = arith.constant 0 : index
    %c0_121 = arith.constant 0 : index
    %297 = vector.load %arg10[%c0_120, %c0_121] : memref<8x128xf32, #tpu.memory_space<vmem>>, vector<8x128xf32>
    tpu.vector_store %arg10[%c0_120, %c0_121], %260 {strides = array<i32>} : memref<8x128xf32, #tpu.memory_space<vmem>>, vector<8x128xf32>,
    %c0_122 = arith.constant 0 : index
    %c0_123 = arith.constant 0 : index
    %298 = vector.load %arg11[%c0_122, %c0_123] : memref<8x128xf32, #tpu.memory_space<vmem>>, vector<8x128xf32>
    tpu.vector_store %arg11[%c0_122, %c0_123], %258 {strides = array<i32>} : memref<8x128xf32, #tpu.memory_space<vmem>>, vector<8x128xf32>,
    %c0_124 = arith.constant 0 : index
    %c0_125 = arith.constant 0 : index
    %299 = vector.load %arg12[%c0_124, %c0_125] : memref<8x128xf32, #tpu.memory_space<vmem>>, vector<8x128xf32>
    tpu.vector_store %arg12[%c0_124, %c0_125], %296 {strides = array<i32>} : memref<8x128xf32, #tpu.memory_space<vmem>>, vector<8x128xf32>,
    %c0_126 = arith.constant 0 : index
    %c0_127 = arith.constant 0 : index
    %300 = vector.load %arg13[%c0_126, %c0_127] : memref<8x128xf32, #tpu.memory_space<vmem>>, vector<8x128xf32>
    tpu.vector_store %arg13[%c0_126, %c0_127], %294 {strides = array<i32>} : memref<8x128xf32, #tpu.memory_space<vmem>>, vector<8x128xf32>,
    %c0_i32_128 = arith.constant 0 : i32
    %301 = arith.cmpi eq, %arg0, %c0_i32_128 : i32
    %302 = arith.extui %301 : i1 to i32
    %c0_i32_129 = arith.constant 0 : i32
    %303 = arith.cmpi ne, %302, %c0_i32_129 : i32
    scf.if %303 {
      %c0_131 = arith.constant 0 : index
      %c0_132 = arith.constant 0 : index
      %307 = vector.load %arg9[%c0_131, %c0_132] : memref<8x128xf32, #tpu.memory_space<vmem>>, vector<8x128xf32>
      tpu.vector_store %arg9[%c0_131, %c0_132], %80 {strides = array<i32>} : memref<8x128xf32, #tpu.memory_space<vmem>>, vector<8x128xf32>,
    } else {
    }
    %c2_i32 = arith.constant 2 : i32
    %304 = arith.cmpi eq, %arg0, %c2_i32 : i32
    %305 = arith.extui %304 : i1 to i32
    %c0_i32_130 = arith.constant 0 : i32
    %306 = arith.cmpi ne, %305, %c0_i32_130 : i32
    scf.if %306 {
      %c0_131 = arith.constant 0 : index
      %c0_132 = arith.constant 0 : index
      %c0_133 = arith.constant 0 : index
      %307 = vector.load %arg7[%c0_131, %c0_132, %c0_133] : memref<2x8x128xf32, #tpu.memory_space<vmem>>, vector<1x8x128xf32>
      %308 = vector.shape_cast %307 : vector<1x8x128xf32> to vector<8x128xf32>
      %309 = vector.shape_cast %116 : vector<8x128xf32> to vector<1x8x128xf32>
      tpu.vector_store %arg7[%c0_131, %c0_132, %c0_133], %309 {strides = array<i32>} : memref<2x8x128xf32, #tpu.memory_space<vmem>>, vector<1x8x128xf32>,
      %c1_134 = arith.constant 1 : index
      %c0_135 = arith.constant 0 : index
      %c0_136 = arith.constant 0 : index
      %310 = vector.load %arg7[%c1_134, %c0_135, %c0_136] : memref<2x8x128xf32, #tpu.memory_space<vmem>>, vector<1x8x128xf32>
      %311 = vector.shape_cast %310 : vector<1x8x128xf32> to vector<8x128xf32>
      %312 = vector.shape_cast %152 : vector<8x128xf32> to vector<1x8x128xf32>
      tpu.vector_store %arg7[%c1_134, %c0_135, %c0_136], %312 {strides = array<i32>} : memref<2x8x128xf32, #tpu.memory_space<vmem>>, vector<1x8x128xf32>,
      %c0_137 = arith.constant 0 : index
      %c0_138 = arith.constant 0 : index
      %c0_139 = arith.constant 0 : index
      %313 = vector.load %arg8[%c0_137, %c0_138, %c0_139] : memref<2x8x128xf32, #tpu.memory_space<vmem>>, vector<1x8x128xf32>
      %314 = vector.shape_cast %313 : vector<1x8x128xf32> to vector<8x128xf32>
      %315 = vector.shape_cast %114 : vector<8x128xf32> to vector<1x8x128xf32>
      tpu.vector_store %arg8[%c0_137, %c0_138, %c0_139], %315 {strides = array<i32>} : memref<2x8x128xf32, #tpu.memory_space<vmem>>, vector<1x8x128xf32>,
      %c1_140 = arith.constant 1 : index
      %c0_141 = arith.constant 0 : index
      %c0_142 = arith.constant 0 : index
      %316 = vector.load %arg8[%c1_140, %c0_141, %c0_142] : memref<2x8x128xf32, #tpu.memory_space<vmem>>, vector<1x8x128xf32>
      %317 = vector.shape_cast %316 : vector<1x8x128xf32> to vector<8x128xf32>
      %318 = vector.shape_cast %150 : vector<8x128xf32> to vector<1x8x128xf32>
      tpu.vector_store %arg8[%c1_140, %c0_141, %c0_142], %318 {strides = array<i32>} : memref<2x8x128xf32, #tpu.memory_space<vmem>>, vector<1x8x128xf32>,
    } else {
    }
    return
  }
  func.func @transform_0(%arg0: i32) -> (i32, i32, i32, i32) {
    %c0_i32 = arith.constant 0 : i32
    %c0_i32_0 = arith.constant 0 : i32
    %c0_i32_1 = arith.constant 0 : i32
    %c0_i32_2 = arith.constant 0 : i32
    return %arg0, %c0_i32, %c0_i32_0, %c0_i32_1 : i32, i32, i32, i32
  }
  func.func @transform_1(%arg0: i32) -> (i32, i32, i32, i32) {
    %c0_i32 = arith.constant 0 : i32
    %c0_i32_0 = arith.constant 0 : i32
    %c0_i32_1 = arith.constant 0 : i32
    %c0_i32_2 = arith.constant 0 : i32
    return %arg0, %c0_i32, %c0_i32_0, %c0_i32_1 : i32, i32, i32, i32
  }
  func.func @transform_2(%arg0: i32) -> (i32, i32) {
    %c0_i32 = arith.constant 0 : i32
    %c0_i32_0 = arith.constant 0 : i32
    %c0_i32_1 = arith.constant 0 : i32
    return %c0_i32, %c0_i32_0 : i32, i32
  }
  func.func @transform_3(%arg0: i32) -> (i32, i32) {
    %c0_i32 = arith.constant 0 : i32
    %c0_i32_0 = arith.constant 0 : i32
    %c0_i32_1 = arith.constant 0 : i32
    return %c0_i32, %c0_i32_0 : i32, i32
  }
  func.func @transform_4(%arg0: i32) -> (i32, i32, i32) {
    %c0_i32 = arith.constant 0 : i32
    %c0_i32_0 = arith.constant 0 : i32
    %c0_i32_1 = arith.constant 0 : i32
    %c0_i32_2 = arith.constant 0 : i32
    return %c0_i32, %c0_i32_0, %c0_i32_1 : i32, i32, i32
  }
  func.func @transform_5(%arg0: i32) -> (i32, i32, i32) {
    %c0_i32 = arith.constant 0 : i32
    %c0_i32_0 = arith.constant 0 : i32
    %c0_i32_1 = arith.constant 0 : i32
    %c0_i32_2 = arith.constant 0 : i32
    return %c0_i32, %c0_i32_0, %c0_i32_1 : i32, i32, i32
  }
  func.func @transform_6(%arg0: i32) -> (i32, i32, i32) {
    %c0_i32 = arith.constant 0 : i32
    %c0_i32_0 = arith.constant 0 : i32
    %c0_i32_1 = arith.constant 0 : i32
    %c0_i32_2 = arith.constant 0 : i32
    return %c0_i32, %c0_i32_0, %c0_i32_1 : i32, i32, i32
  }
  func.func @transform_7(%arg0: i32) -> (i32, i32, i32) {
    %c0_i32 = arith.constant 0 : i32
    %c0_i32_0 = arith.constant 0 : i32
    %c0_i32_1 = arith.constant 0 : i32
    %c0_i32_2 = arith.constant 0 : i32
    return %c0_i32, %c0_i32_0, %c0_i32_1 : i32, i32, i32
  }
  func.func @transform_8(%arg0: i32) -> (i32, i32) {
    %c0_i32 = arith.constant 0 : i32
    %c0_i32_0 = arith.constant 0 : i32
    %c0_i32_1 = arith.constant 0 : i32
    return %c0_i32, %c0_i32_0 : i32, i32
  }
}

</mosaic_0001>

<bundles_post_ra>
// kernel: tpu_custom_call.1
= control target key start
LH: loop header
LB: loop body
LE: loop exit
PB: predicated region body
PF: predicated region fallthrough
CT: control target
= control target key end

     0   :  { %s3393_s0 = inlined_call_operand.hbm [shape: f32[3,4,8,512], index: 0, kind: input, shape index: {}]   ;;  %s3394_s1 = inlined_call_operand.hbm [shape: f32[3,4,8,512], index: 1, kind: input, shape index: {}]   ;;  %s3395_s2 = inlined_call_operand.hbm [shape: bf16[128,512], index: 2, kind: input, shape index: {}]   ;;  %s3396_s3 = inlined_call_operand.hbm [shape: bf16[128,512], index: 3, kind: input, shape index: {}]   ;;  %s3397_s4 = inlined_call_operand.hbm [shape: f32[2,8,128], index: 4, kind: input, shape index: {}]   ;;  %s3398_s5 = inlined_call_operand.vmem [shape: f32[2,8,128], index: 5, kind: input, shape index: {}]   ;;  %s3399_s6 = inlined_call_operand.hbm [shape: f32[2,8,128], index: 6, kind: output, shape index: {0}]   ;;  %s3400_s7 = inlined_call_operand.hbm [shape: f32[2,8,128], index: 7, kind: output, shape index: {1}]   ;;  %s3401_s8 = inlined_call_operand.hbm [shape: f32[8,128], index: 8, kind: output, shape index: {2}]  }
   0x1   :  { %3457 = sst [smem:[#allocation52_spill]] %s3393_s0 }
   0x2   :  { %3458 = sst [smem:[#allocation53_spill]] %s3395_s2 }
   0x3   :  { %14 = vsyncpa [#allocation7], 0 }
   0x4   :  { %16 = vsyncpa [#allocation7 + $0x1], 0 }
   0x5   :  { %17 = vsyncpa [#allocation10], 0 }
   0x6   :  { %19 = vsyncpa [#allocation10 + $0x1], 0 }
   0x7   :  { %20 = vsyncpa [#allocation13], 0 }
   0x8   :  { %21 = vsyncpa [#allocation8], 0 }
   0x9   :  { %22 = vsyncpa [#allocation17], 0  ;;  %s2586_s27 = smov 0   ;;  %s2588_s28 = smov 0  }
   0xa   :  { %s2590_s29 = smov 0   ;;  %s2592_s30 = smov 0  }
   0xb LB: > { %s2605_s9 = sadd.s32 4294967295, %s2522_s30   ;;  %p48_p0 = scmp.ne.s32.totalorder %s2514_s28, %s2510_s27  ;;  %s2522_s30 = sphi %s2592_s30, %s3553_s30   ;;  %s2518_s29 = sphi %s2590_s29, %s3552_s29   ;;  %s2514_s28 = sphi %s2588_s28, %s3551_s28   ;;  %s2510_s27 = sphi %s2586_s27, %s3550_s27  }
   0xc   : > { %p3402_p1 = scmp.eq.s32.totalorder %s2605_s9, 0  ;;  %p1846_p2 = scmp.ge.s32.totalorder %s2522_s30, 1 }
   0xd   : > { %p232_p3 = scmp.lt.s32.totalorder %s2522_s30, 4  ;;  %s2524_s12 = smov [#allocation11]  }
   0xe   : > { %p2614_p5 = por %p3402_p1, %p48_p0  ;;  %s244_s13 = sshll.u32 %s2524_s12, 4  ;;  %s2622_s13 = int_to_ptr.vmem [resolvable:$true] %s244_s13 }
   0xf   : > { %p2618_p6 = pnand %p1846_p2, %p232_p3  ;;  %s2525_s15 = smov [#allocation12]  }
  0x10   : > { %s3459_s10 = scalar_select %p2614_p5, 1, 0 }
  0x11   : > { %s3460_s11 = scalar_select %p2618_p6, 1, 0 }
  0x12   : > { %p1993_p7 = pneg %p2618_p6  ;;  %s257_s16 = sshll.u32 %s2525_s15, 4  ;;  %s2632_s16 = int_to_ptr.vmem [resolvable:$true] %s257_s16 }
  0x13   : > { %s2526_s17 = smov [#allocation14]   ;;  %s3462_s2 = sld [smem:[#allocation53_spill]] }
  0x14   : > { %p2628_p8 = pnand %p1993_p7, %p3402_p1  ;;  %s2634_s18 = sshll.u32 %s2526_s17, 4  ;;  %s271_s18 = int_to_ptr.vmem [resolvable:$true] %s2634_s18 }
  0x16   : > { %p2644_p10 = pneg %p2628_p8 }
  0x19   : > { %s2246_s21 = scalar_lea.hbm %s3462_s2, 4096 }
  0x1a   : > { %p2247_p9 = scmp.ne.s32.totalorder %s3462_s2, %s2246_s21  ;;  %p2253_p13 = scmp.lt.u32.totalorder %s2246_s21, %s3462_s2 }
  0x1c   : > { %p2249_p11 = pnand %p2644_p10, %p2247_p9 }
  0x1e   : > { %p2250_p12 = pneg %p2249_p11 }
  0x20   : > { %p2255_p0 = pnand %p2253_p13, %p2250_p12 }
  0x22   : > { %2258 = shalt.err (!%p2255_p0)
}
  0x23   : > { %s2259_s27 = scalar_lea.vmem %s2622_s13, 4096  ;;  %p2267_p4 = scmp.lt.s32.totalorder %s2622_s13, %s2622_s13 }
  0x24   : > { %p2260_p2 = scmp.ne.s32.totalorder %s2622_s13, %s2259_s27  ;;  %p2268_p1 = scmp.lt.s32.totalorder %s2259_s27, %s2259_s27 }
  0x26   : > { %p2262_p3 = pnand %p2260_p2, %p2644_p10  ;;  %p2269_p9 = por %p2268_p1, %p2267_p4 }
  0x28   : > { %p2263_p7 = pneg %p2262_p3 }
  0x2a   : > { %p2270_p11 = pnand %p2269_p9, %p2263_p7 }
  0x2c   : > { %2273 = shalt.err (!%p2270_p11)
}
  0x2d   : > { %s2527_s12 = smov 256   ;;  %s2528_s15 = smov 16  }
  0x2e   : > { %1996 = dma.hbm_to_vmem [thread:$0]  (!%p2628_p8), %s3462_s2, 4096, %s2622_s13, [#allocation10], %s2527_s12, %s2527_s12, %s2528_s15  }
  0x2f   : > { %s2274_s22 = scalar_lea.hbm %s3396_s3, 4096 }
  0x30   : > { %p2275_p1 = scmp.ne.s32.totalorder %s3396_s3, %s2274_s22  ;;  %p2281_p13 = scmp.lt.u32.totalorder %s2274_s22, %s3396_s3 }
  0x32   : > { %p2277_p4 = pnand %p2275_p1, %p2644_p10 }
  0x34   : > { %p2278_p12 = pneg %p2277_p4 }
  0x36   : > { %p2283_p0 = pnand %p2281_p13, %p2278_p12 }
  0x38   : > { %2286 = shalt.err (!%p2283_p0)
}
  0x39   : > { %s2287_s13 = scalar_lea.vmem %s2632_s16, 4096  ;;  %p2295_p9 = scmp.lt.s32.totalorder %s2632_s16, %s2632_s16 }
  0x3a   : > { %p2288_p2 = scmp.ne.s32.totalorder %s2632_s16, %s2287_s13  ;;  %p2296_p11 = scmp.lt.s32.totalorder %s2287_s13, %s2287_s13 }
  0x3c   : > { %p2290_p3 = pnand %p2288_p2, %p2644_p10  ;;  %p2297_p1 = por %p2296_p11, %p2295_p9 }
  0x3e   : > { %p2291_p7 = pneg %p2290_p3 }
  0x40   : > { %p2298_p4 = pnand %p2297_p1, %p2291_p7 }
  0x42   : > { %2301 = shalt.err (!%p2298_p4)
}
  0x43   : > { %1999 = dma.hbm_to_vmem [thread:$0]  (!%p2628_p8), %s3396_s3, 4096, %s2632_s16, [#allocation13], %s2527_s12, %s2527_s12, %s2528_s15  }
  0x44   : > { %s2302_s22 = scalar_lea.hbm %s3397_s4, 256 }
  0x45   : > { %p2303_p12 = scmp.ne.s32.totalorder %s3397_s4, %s2302_s22  ;;  %p2309_p2 = scmp.lt.u32.totalorder %s2302_s22, %s3397_s4 }
  0x47   : > { %p2305_p13 = pnand %p2303_p12, %p2644_p10 }
  0x49   : > { %p2306_p0 = pneg %p2305_p13 }
  0x4b   : > { %p2311_p3 = pnand %p2309_p2, %p2306_p0 }
  0x4d   : > { %2314 = shalt.err (!%p2311_p3)
}
  0x4e   : > { %s2315_s13 = scalar_lea.vmem %s271_s18, 256  ;;  %p2323_p1 = scmp.lt.s32.totalorder %s271_s18, %s271_s18 }
  0x4f   : > { %p2316_p7 = scmp.ne.s32.totalorder %s271_s18, %s2315_s13  ;;  %p2324_p4 = scmp.lt.s32.totalorder %s2315_s13, %s2315_s13 }
  0x51   : > { %p2318_p9 = pnand %p2316_p7, %p2644_p10  ;;  %p2325_p5 = por %p2324_p4, %p2323_p1 }
  0x53   : > { %p2319_p11 = pneg %p2318_p9 }
  0x55   : > { %p2326_p6 = pnand %p2325_p5, %p2319_p11 }
  0x57   : > { %2329 = shalt.err (!%p2326_p6)
}
  0x58   : > { %s2529_s16 = smov 128   ;;  %s2530_s24 = smov 8  }
  0x59   : > { %2002 = dma.hbm_to_vmem [thread:$0]  (!%p2628_p8), %s3397_s4, 256, %s271_s18, [#allocation13], %s2529_s16, %s2529_s16, %s2530_s24  }
  0x5a   : > { %s2708_s17 = sadd.s32 1, %s2522_s30   ;;  %s35_s20 = sadd.s32 1, %s2518_s29 }
  0x5b   : > { %s32_s19 = ssub.s32 %s2522_s30, %s2708_s17  ;;  %p42_p6 = scmp.ne.s32.totalorder %s2518_s29, %s2514_s28 }
  0x5c   : > { %p33_p5 = scmp.eq.s32.totalorder %s32_s19, 0  ;;  %p43_p10 = scmp.eq.s32.totalorder %s2522_s30, 0 }
  0x5d   : > { %p2013_p12 = scmp.lt.s32.totalorder %s2522_s30, 3  ;;  %s287_s22 = sand.u32 1, %s2518_s29  }
  0x5e   : > { %s2718_s21 = scalar_select %p33_p5, %s2518_s29, %s35_s20  }
  0x5f   : > { %p44_p13 = por %p43_p10, %p42_p6  ;;  %s2721_s23 = sshll.u32 %s287_s22, 7 }
  0x60   : > { %s1963_s14 = sshll.u32 %s2522_s30, 11  ;;  %s3464_s0 = sld [smem:[#allocation52_spill]] }
  0x61   : > { %s291_s27 = scalar_lea.vmem [#allocation6], %s2721_s23  ;;  %p2734_p8 = pnand %p2013_p12, %p44_p13 }
  0x62   : > { %s298_s13 = sshll.u32 %s291_s27, 4  ;;  %s2738_s24 = scalar_lea.sflag [#allocation7], %s287_s22  ;;  %s2732_s13 = int_to_ptr.vmem [resolvable:$true] %s298_s13 }
  0x63   : > { %p2332_p2 = pneg %p2734_p8 }
  0x66   : > { %s2729_s26 = scalar_lea.hbm %s3464_s0, %s1963_s14  ;;  %s2335_s20 = scalar_lea.hbm %s3464_s0, 6144 }
  0x67   : > { %s2330_s12 = scalar_lea.hbm %s2729_s26, 2048  ;;  %p2336_p9 = scmp.lt.u32.totalorder %s2729_s26, %s3464_s0 }
  0x68   : > { %p2331_p0 = scmp.ne.s32.totalorder %s2729_s26, %s2330_s12  ;;  %p2337_p11 = scmp.lt.u32.totalorder %s2335_s20, %s2330_s12 }
  0x69   : > { %p2339_p4 = scmp.lt.u32.totalorder %s2330_s12, %s2729_s26 }
  0x6a   : > { %p2333_p3 = pnand %p2332_p2, %p2331_p0  ;;  %p2338_p1 = por %p2337_p11, %p2336_p9 }
  0x6c   : > { %p2334_p7 = pneg %p2333_p3  ;;  %p2340_p5 = por %p2339_p4, %p2338_p1 }
  0x6e   : > { %p2341_p6 = pnand %p2340_p5, %p2334_p7 }
  0x70   : > { %2344 = shalt.err (!%p2341_p6)
}
  0x71   : > { %s2345_s22 = scalar_lea.vmem %s2732_s13, 2048  ;;  %s2531_s27 = smov [#allocation6]  }
  0x72   : > { %p2346_p10 = scmp.ne.s32.totalorder %s2732_s13, %s2345_s22  ;;  %s2350_s15 = sshll.u32 %s2531_s27, 4  ;;  %s2351_s15 = int_to_ptr.vmem [resolvable:$false] %s2350_s15 }
  0x73   : > { %s2352_s19 = scalar_lea.vmem %s2351_s15, 4096  ;;  %p2353_p0 = scmp.lt.s32.totalorder %s2732_s13, %s2351_s15 }
  0x74   : > { %p2348_p12 = pnand %p2346_p10, %p2332_p2  ;;  %p2354_p3 = scmp.lt.s32.totalorder %s2352_s19, %s2345_s22 }
  0x76   : > { %p2349_p13 = pneg %p2348_p12  ;;  %p2355_p9 = por %p2354_p3, %p2353_p0 }
  0x78   : > { %p2356_p11 = pnand %p2355_p9, %p2349_p13 }
  0x7a   : > { %2359 = shalt.err (!%p2356_p11)
}
  0x7b   : > { %s2532_s12 = smov 512   ;;  %s2533_s20 = smov 32  }
  0x7c   : > { %2006 = dma.hbm_to_vmem [thread:$0]  (!%p2734_p8), %s2729_s26, 2048, %s2732_s13, %s2738_s24, %s2532_s12, %s2532_s12, %s2533_s20  }
  0x7d   : > { %s2774_s22 = scalar_lea.hbm %s3394_s1, %s1963_s14  ;;  %s312_s27 = scalar_lea.vmem [#allocation9], %s2721_s23 }
  0x7e   : > { %s319_s15 = sshll.u32 %s312_s27, 4  ;;  %s308_s19 = sand.u32 1, %s2522_s30   ;;  %s2777_s15 = int_to_ptr.vmem [resolvable:$true] %s319_s15 }
  0x7f   : > { %s2780_s0 = scalar_lea.sflag [#allocation10], %s308_s19  ;;  %s2360_s2 = scalar_lea.hbm %s2774_s22, 2048 }
  0x80   : > { %p2361_p7 = scmp.ne.s32.totalorder %s2774_s22, %s2360_s2  ;;  %s2365_s13 = scalar_lea.hbm %s3394_s1, 6144 }
  0x81   : > { %p2366_p5 = scmp.lt.u32.totalorder %s2774_s22, %s3394_s1  ;;  %p2367_p6 = scmp.lt.u32.totalorder %s2365_s13, %s2360_s2 }
  0x82   : > { %p2363_p1 = pnand %p2361_p7, %p2332_p2  ;;  %p2369_p12 = scmp.lt.u32.totalorder %s2360_s2, %s2774_s22 }
  0x83   : > { %p2368_p10 = por %p2367_p6, %p2366_p5 }
  0x84   : > { %p2364_p4 = pneg %p2363_p1 }
  0x85   : > { %p2370_p13 = por %p2369_p12, %p2368_p10 }
  0x87   : > { %p2371_p0 = pnand %p2370_p13, %p2364_p4 }
  0x89   : > { %2374 = shalt.err (!%p2371_p0)
}
  0x8a   : > { %s2375_s30 = scalar_lea.vmem %s2777_s15, 2048  ;;  %s2534_s23 = smov [#allocation9]  }
  0x8b   : > { %p2376_p3 = scmp.ne.s32.totalorder %s2777_s15, %s2375_s30  ;;  %s2380_s18 = sshll.u32 %s2534_s23, 4  ;;  %s2381_s18 = int_to_ptr.vmem [resolvable:$false] %s2380_s18 }
  0x8c   : > { %s2382_s27 = scalar_lea.vmem %s2381_s18, 4096  ;;  %p2383_p7 = scmp.lt.s32.totalorder %s2777_s15, %s2381_s18 }
  0x8d   : > { %p2378_p9 = pnand %p2376_p3, %p2332_p2  ;;  %p2384_p1 = scmp.lt.s32.totalorder %s2382_s27, %s2375_s30 }
  0x8f   : > { %p2379_p11 = pneg %p2378_p9  ;;  %p2385_p5 = por %p2384_p1, %p2383_p7 }
  0x91   : > { %p2386_p6 = pnand %p2385_p5, %p2379_p11 }
  0x93   : > { %2389 = shalt.err (!%p2386_p6)
}
  0x94   : > { %2009 = dma.hbm_to_vmem [thread:$0]  (!%p2734_p8), %s2774_s22, 2048, %s2777_s15, %s2780_s0, %s2532_s12, %s2532_s12, %s2533_s20  }
  0x95   : > { %p3466_p2 = scmp.ne.s32.totalorder %s3460_s11, 0 }
  0x97   : > { %331 = sbr.rel (%p3466_p2) target bundleno = 1330 (0x532), region = 44 }
  0x9e   : > { %s333_s2 = sand.u32 1, %s2514_s28   ;;  %p3467_p4 = scmp.ne.s32.totalorder %s3459_s10, 0 }
  0x9f   : > { %s1858_s19 = sshll.u32 %s333_s2, 7  ;;  %s334_s26 = scalar_lea.sflag [#allocation7], %s333_s2 }
  0xa0   : > { %s2812_s14 = scalar_lea.vmem [#allocation6], %s1858_s19 }
  0xa1   : > { %2485 = dma.done.wait (%p3467_p4), %s334_s26, 2048  }
  0xa2   : > { %2487 = vsyncadd (%p3467_p4), %s334_s26, 4294965248  ;;  %s342_s16 = sand.u32 1, %s2605_s9   ;;  %s2819_s0 = scalar_lea.vmem [#allocation9], %s1858_s19 }
  0xa3   : > { %s343_s13 = scalar_lea.sflag [#allocation10], %s342_s16 }
  0xa4   : > { %2489 = dma.done.wait (%p3467_p4), %s343_s13, 2048  }
  0xa5   : > { %2491 = vsyncadd (%p3467_p4), %s343_s13, 4294965248  ;;  %p3468_p8 = scmp.eq.s32.totalorder %s2605_s9, 0 }
  0xa7   : > { %2493 = dma.done.wait (%p3468_p8), [#allocation10], 4096   ;;  %p3469_p10 = pmov %p3468_p8 }
  0xa8   : > { %p3470_p12 = pmov %p3468_p8 }
  0xa9   : > { %2495 = vsyncadd (%p3469_p10), [#allocation10], 4294963200 }
  0xaa   : > { %2497 = dma.done.wait (%p3470_p12), [#allocation13], 4352   ;;  %p3471_p13 = pmov %p3468_p8 }
  0xab   : > { %p3472_p0 = scmp.ne.s32.totalorder %s2605_s9, 0 }
  0xac   : > { %2499 = vsyncadd (%p3471_p13), [#allocation13], 4294962944  ;;  %v396_v0 = vld [vmem:[#allocation14] sm:$0xff] (!%p3472_p0)  ;;  %v401_v2 = vld [vmem:[#allocation14 + $0x8] sm:$0xff] (!%p3472_p0) }
  0xad   : > { %395 = sbr.rel (%p3472_p0) target bundleno = 180 (0xb4), region = 68  ;;  %v398_v1 = vld [vmem:[%s3398_s5] sm:$0xff] (!%p3472_p0)  ;;  %397 = vst [vmem:[#allocation2] sm:$0xff] (!%p3472_p0), %v396_v0  ;;  %402 = vst [vmem:[#allocation4] sm:$0xff] (!%p3472_p0), %v401_v2  ;;  %v1864_v3 = vld [vmem:[%s3398_s5 + $0x8] sm:$0xff] (!%p3472_p0) }
  0xae   : > { %399 = vst [vmem:[#allocation3] sm:$0xff] (!%p3472_p0), %v398_v1  ;;  %405 = vst [vmem:[#allocation5] sm:$0xff] (!%p3472_p0), %v1864_v3 }
  0xb4 PF: > { %v2841_v4 = vld [vmem:[#allocation11 + $0x4] ss:$16 sps:$4 sm:$0xff]   ;;  %v2843_v5 = vld [vmem:[#allocation11] ss:$16 sps:$4 sm:$0xff]   ;;  %v3405_v6 = vmov 0   ;;  %p3548_p3 = scmp.ne.s32.totalorder %s2605_s9, 0 }
  0xb5   : > { %671 = vmatprep.mubr.bf16.mxu0 %v3405_v6  ;;  %712 = vmatprep.mubr.bf16.mxu1 %v3405_v6  ;;  %v2848_v7 = vld [vmem:[#allocation11 + $0x24] ss:$16 sps:$4 sm:$0xff]   ;;  %v2851_v8 = vld [vmem:[#allocation11 + $0xc] ss:$16 sps:$4 sm:$0xff]   ;;  %v2853_v9 = vld [vmem:[#allocation11 + $0x20] ss:$16 sps:$4 sm:$0xff]  }
  0xb6   : > { %639 = vmatprep.subr.bf16.mxu0 %v2841_v4  ;;  %v2855_v10 = vld [vmem:[#allocation11 + $0x8] ss:$16 sps:$4 sm:$0xff]   ;;  %v2858_v11 = vld [vmem:[#allocation11 + $0x44] ss:$16 sps:$4 sm:$0xff]   ;;  %680 = vmatprep.subr.bf16.mxu1 %v2851_v8  ;;  %v2861_v12 = vld [vmem:[#allocation11 + $0x2c] ss:$16 sps:$4 sm:$0xff]  }
  0xb7   : > { %640 = vmatpush1.bf16.msra.mxu0 %v2843_v5  ;;  %681 = vmatpush1.bf16.msra.mxu1 %v2855_v10  ;;  %v2864_v13 = vld [vmem:[#allocation11 + $0x28] ss:$16 sps:$4 sm:$0xff]   ;;  %v2868_v14 = vld [vmem:[#allocation11 + $0x40] ss:$16 sps:$4 sm:$0xff]   ;;  %v2871_v15 = vld [vmem:[#allocation11 + $0x64] ss:$16 sps:$4 sm:$0xff]  }
  0xb8   : > { %641 = vmatprep.subr.bf16.mxu0 %v2848_v7  ;;  %682 = vmatprep.subr.bf16.mxu1 %v2861_v12  ;;  %3473 = vst [vmem:[#allocation25_spill] sm:$0xff] %v2871_v15  ;;  %v2873_v16 = vld [vmem:[#allocation11 + $0x4c] ss:$16 sps:$4 sm:$0xff]   ;;  %v2876_v17 = vld [vmem:[#allocation11 + $0x48] ss:$16 sps:$4 sm:$0xff]   ;;  %v470_v35 = vld [vmem:[#allocation2] sm:$0xff] }
  0xb9   : > { %3474 = vst [vmem:[#allocation26_spill] sm:$0xff] %v2876_v17  ;;  %v2880_v18 = vld [vmem:[#allocation11 + $0x60] ss:$16 sps:$4 sm:$0xff]   ;;  %v2882_v19 = vld [vmem:[#allocation11 + $0x6c] ss:$16 sps:$4 sm:$0xff]   ;;  %v478_v38 = vpack.c.bf16 %v470_v35, %v470_v35 }
  0xba   : > { %3475 = vst [vmem:[#allocation27_spill] sm:$0xff] %v2880_v18  ;;  %3476 = vst [vmem:[#allocation28_spill] sm:$0xff] %v2882_v19  ;;  %v2885_v20 = vld [vmem:[#allocation11 + $0x84] ss:$16 sps:$4 sm:$0xff]   ;;  %v2888_v21 = vld [vmem:[#allocation11 + $0x80] ss:$16 sps:$4 sm:$0xff]  }
  0xbb   : > { %642 = vmatpush1.bf16.msra.mxu0 %v2853_v9  ;;  %683 = vmatpush1.bf16.msra.mxu1 %v2864_v13  ;;  %3477 = vst [vmem:[#allocation29_spill] sm:$0xff] %v2885_v20  ;;  %3478 = vst [vmem:[#allocation30_spill] sm:$0xff] %v2888_v21  ;;  %v2890_v22 = vld [vmem:[#allocation11 + $0x68] ss:$16 sps:$4 sm:$0xff]   ;;  %v2894_v23 = vld [vmem:[#allocation11 + $0x8c] ss:$16 sps:$4 sm:$0xff]  }
  0xbc   : > { %643 = vmatprep.subr.bf16.mxu0 %v2858_v11  ;;  %684 = vmatprep.subr.bf16.mxu1 %v2873_v16  ;;  %3479 = vst [vmem:[#allocation31_spill] sm:$0xff] %v2890_v22  ;;  %3480 = vst [vmem:[#allocation32_spill] sm:$0xff] %v2894_v23  ;;  %v2897_v24 = vld [vmem:[#allocation11 + $0xa4] ss:$16 sps:$4 sm:$0xff]   ;;  %v2900_v25 = vld [vmem:[#allocation11 + $0x88] ss:$16 sps:$4 sm:$0xff]  }
  0xbd   : > { %3481 = vst [vmem:[#allocation33_spill] sm:$0xff] %v2897_v24  ;;  %3482 = vst [vmem:[#allocation34_spill] sm:$0xff] %v2900_v25  ;;  %v2904_v26 = vld [vmem:[#allocation11 + $0xa0] ss:$16 sps:$4 sm:$0xff]   ;;  %v2906_v27 = vld [vmem:[#allocation11 + $0xac] ss:$16 sps:$4 sm:$0xff]  }
  0xbe   : > { %3483 = vst [vmem:[#allocation35_spill] sm:$0xff] %v2904_v26  ;;  %3484 = vst [vmem:[#allocation36_spill] sm:$0xff] %v2906_v27  ;;  %v2909_v28 = vld [vmem:[#allocation11 + $0xc4] ss:$16 sps:$4 sm:$0xff]   ;;  %v2912_v29 = vld [vmem:[#allocation11 + $0xc0] ss:$16 sps:$4 sm:$0xff]  }
  0xbf   : > { %644 = vmatpush1.bf16.msra.mxu0 %v2868_v14  ;;  %685 = vmatpush1.bf16.msra.mxu1 %v2876_v17  ;;  %3485 = vst [vmem:[#allocation37_spill] sm:$0xff] %v2909_v28  ;;  %3486 = vst [vmem:[#allocation38_spill] sm:$0xff] %v2912_v29  ;;  %v2914_v30 = vld [vmem:[#allocation11 + $0xa8] ss:$16 sps:$4 sm:$0xff]   ;;  %v2918_v31 = vld [vmem:[#allocation11 + $0xcc] ss:$16 sps:$4 sm:$0xff]  }
  0xc0   : > { %645 = vmatprep.subr.bf16.mxu0 %v2871_v15  ;;  %686 = vmatprep.subr.bf16.mxu1 %v2882_v19  ;;  %3487 = vst [vmem:[#allocation39_spill] sm:$0xff] %v2914_v30  ;;  %3488 = vst [vmem:[#allocation40_spill] sm:$0xff] %v2918_v31  ;;  %v2921_v32 = vld [vmem:[#allocation11 + $0xe4] ss:$16 sps:$4 sm:$0xff]   ;;  %v2923_v33 = vld [vmem:[#allocation11 + $0xe0] ss:$16 sps:$4 sm:$0xff]  }
  0xc1   : > { %3489 = vst [vmem:[#allocation41_spill] sm:$0xff] %v2921_v32  ;;  %3490 = vst [vmem:[#allocation42_spill] sm:$0xff] %v2923_v33  ;;  %v2926_v34 = vld [vmem:[#allocation11 + $0xc8] ss:$16 sps:$4 sm:$0xff]   ;;  %v2930_v36 = vld [vmem:[#allocation11 + $0xec] ss:$16 sps:$4 sm:$0xff]  }
  0xc2   : > { %3491 = vst [vmem:[#allocation43_spill] sm:$0xff] %v2926_v34  ;;  %3492 = vst [vmem:[#allocation44_spill] sm:$0xff] %v2930_v36  ;;  %v2933_v37 = vld [vmem:[#allocation12 + $0x4] ss:$16 sps:$4 sm:$0xff]   ;;  %v2936_v39 = vld [vmem:[#allocation11 + $0xe8] ss:$16 sps:$4 sm:$0xff]  }
  0xc3   : > { %646 = vmatpush1.bf16.msra.mxu0 %v2880_v18  ;;  %687 = vmatpush1.bf16.msra.mxu1 %v2890_v22  ;;  %3493 = vst [vmem:[#allocation45_spill] sm:$0xff] %v2933_v37  ;;  %3494 = vst [vmem:[#allocation46_spill] sm:$0xff] %v2936_v39  ;;  %v2938_v40 = vld [vmem:[#allocation12] ss:$16 sps:$4 sm:$0xff]   ;;  %v2942_v41 = vld [vmem:[#allocation12 + $0xc] ss:$16 sps:$4 sm:$0xff]  }
  0xc4   : > { %647 = vmatprep.subr.bf16.mxu0 %v2885_v20  ;;  %688 = vmatprep.subr.bf16.mxu1 %v2894_v23  ;;  %3495 = vst [vmem:[#allocation47_spill] sm:$0xff] %v2942_v41  ;;  %v2945_v42 = vld [vmem:[#allocation12 + $0x24] ss:$16 sps:$4 sm:$0xff]   ;;  %v2948_v43 = vld [vmem:[#allocation12 + $0x8] ss:$16 sps:$4 sm:$0xff]  }
  0xc5   : > { %v2952_v44 = vld [vmem:[#allocation12 + $0x20] ss:$16 sps:$4 sm:$0xff]   ;;  %v2954_v45 = vld [vmem:[#allocation12 + $0x2c] ss:$16 sps:$4 sm:$0xff]   ;;  %v2957_v46 = vld [vmem:[#allocation12 + $0x44] ss:$16 sps:$4 sm:$0xff]  }
  0xc6   : > { %v2961_v47 = vld [vmem:[#allocation12 + $0x40] ss:$16 sps:$4 sm:$0xff]   ;;  %v2963_v48 = vld [vmem:[#allocation12 + $0x28] ss:$16 sps:$4 sm:$0xff]   ;;  %v2968_v49 = vld [vmem:[#allocation12 + $0x4c] ss:$16 sps:$4 sm:$0xff]  }
  0xc7   : > { %648 = vmatpush1.bf16.msra.mxu0 %v2888_v21  ;;  %689 = vmatpush1.bf16.msra.mxu1 %v2900_v25  ;;  %v2971_v50 = vld [vmem:[#allocation12 + $0x64] ss:$16 sps:$4 sm:$0xff]   ;;  %v2974_v51 = vld [vmem:[#allocation12 + $0x48] ss:$16 sps:$4 sm:$0xff]   ;;  %v2978_v52 = vld [vmem:[#allocation12 + $0x60] ss:$16 sps:$4 sm:$0xff]  }
  0xc8   : > { %649 = vmatprep.subr.bf16.mxu0 %v2897_v24  ;;  %690 = vmatprep.subr.bf16.mxu1 %v2906_v27  ;;  %v2980_v53 = vld [vmem:[#allocation12 + $0x6c] ss:$16 sps:$4 sm:$0xff]   ;;  %v2983_v54 = vld [vmem:[#allocation12 + $0x84] ss:$16 sps:$4 sm:$0xff]   ;;  %v2986_v55 = vld [vmem:[#allocation12 + $0x68] ss:$16 sps:$4 sm:$0xff]  }
  0xc9   : > { %v2990_v56 = vld [vmem:[#allocation12 + $0x80] ss:$16 sps:$4 sm:$0xff]   ;;  %v2992_v57 = vld [vmem:[#allocation12 + $0x8c] ss:$16 sps:$4 sm:$0xff]   ;;  %v2995_v58 = vld [vmem:[#allocation12 + $0xa4] ss:$16 sps:$4 sm:$0xff]  }
  0xca   : > { %v2998_v59 = vld [vmem:[#allocation12 + $0x88] ss:$16 sps:$4 sm:$0xff]   ;;  %v3002_v60 = vld [vmem:[#allocation12 + $0xa0] ss:$16 sps:$4 sm:$0xff]   ;;  %v3004_v61 = vld [vmem:[#allocation12 + $0xac] ss:$16 sps:$4 sm:$0xff]  }
  0xcb   : > { %650 = vmatpush1.bf16.msra.mxu0 %v2904_v26  ;;  %691 = vmatpush1.bf16.msra.mxu1 %v2914_v30  ;;  %3496 = vst [vmem:[#allocation48_spill] sm:$0xff] %v3002_v60  ;;  %v3007_v62 = vld [vmem:[#allocation12 + $0xc4] ss:$16 sps:$4 sm:$0xff]   ;;  %v3010_v63 = vld [vmem:[#allocation12 + $0xa8] ss:$16 sps:$4 sm:$0xff]  }
  0xcc   : > { %651 = vmatprep.subr.bf16.mxu0 %v2909_v28  ;;  %692 = vmatprep.subr.bf16.mxu1 %v2918_v31  ;;  %3497 = vst [vmem:[#allocation49_spill] sm:$0xff] %v3007_v62  ;;  %v3014_v0 = vld [vmem:[#allocation12 + $0xc0] ss:$16 sps:$4 sm:$0xff]   ;;  %v3016_v1 = vld [vmem:[#allocation12 + $0xcc] ss:$16 sps:$4 sm:$0xff]  }
  0xcd   : > { %v3019_v2 = vld [vmem:[#allocation12 + $0xe4] ss:$16 sps:$4 sm:$0xff]   ;;  %v3022_v3 = vld [vmem:[#allocation12 + $0xc8] ss:$16 sps:$4 sm:$0xff]   ;;  %v3026_v35 = vld [vmem:[#allocation12 + $0xe0] ss:$16 sps:$4 sm:$0xff]  }
  0xce   : > { %3498 = vst [vmem:[#allocation50_spill] sm:$0xff] %v3019_v2 }
  0xcf   : > { %652 = vmatpush1.bf16.msra.mxu0 %v2912_v29  ;;  %693 = vmatpush1.bf16.msra.mxu1 %v2926_v34 }
  0xd0   : > { %653 = vmatprep.subr.bf16.mxu0 %v2921_v32  ;;  %694 = vmatprep.subr.bf16.mxu1 %v2930_v36 }
  0xd3   : > { %654 = vmatpush1.bf16.msra.mxu0 %v2923_v33  ;;  %695 = vmatpush1.bf16.msra.mxu1 %v2936_v39 }
  0xd4   : > { %908 = vmatprep.subr.bf16.mxu0 %v2933_v37  ;;  %949 = vmatprep.subr.bf16.mxu1 %v2942_v41 }
  0xd6   : > { %672 = vmatmul.mubr.bf16.vlgmr.msra.gmra.mrb[0].mxu0 %v478_v38  ;;  %713 = vmatmul.mubr.bf16.vlgmr.msra.gmra.mrb[0].mxu1 %v478_v38  ;;  %v472_v38 = vld [vmem:[#allocation4] sm:$0xff] }
  0xd7   : > { %909 = vmatpush1.bf16.msra.mxu0 %v2938_v40  ;;  %940 = vmatprep.mubr.bf16.mxu0 %v3405_v6 }
  0xd8   : > { %910 = vmatprep.subr.bf16.mxu0 %v2945_v42  ;;  %950 = vmatpush1.bf16.msra.mxu1 %v2948_v43 }
  0xd9   : > { %981 = vmatprep.mubr.bf16.mxu1 %v3405_v6  ;;  %951 = vmatprep.subr.bf16.mxu1 %v2954_v45  ;;  %v3028_v6 = vld [vmem:[#allocation12 + $0xec] ss:$16 sps:$4 sm:$0xff]  }
  0xdb   : > { %911 = vmatpush1.bf16.msra.mxu0 %v2952_v44 }
  0xdc   : > { %912 = vmatprep.subr.bf16.mxu0 %v2957_v46  ;;  %952 = vmatpush1.bf16.msra.mxu1 %v2963_v48 }
  0xdd   : > { %953 = vmatprep.subr.bf16.mxu1 %v2968_v49 }
  0xdf   : > { %913 = vmatpush1.bf16.msra.mxu0 %v2961_v47 }
  0xe0   : > { %914 = vmatprep.subr.bf16.mxu0 %v2971_v50  ;;  %954 = vmatpush1.bf16.msra.mxu1 %v2974_v51 }
  0xe1   : > { %955 = vmatprep.subr.bf16.mxu1 %v2980_v53 }
  0xe3   : > { %915 = vmatpush1.bf16.msra.mxu0 %v2978_v52 }
  0xe4   : > { %916 = vmatprep.subr.bf16.mxu0 %v2983_v54  ;;  %956 = vmatpush1.bf16.msra.mxu1 %v2986_v55 }
  0xe5   : > { %957 = vmatprep.subr.bf16.mxu1 %v2992_v57 }
  0xe7   : > { %917 = vmatpush1.bf16.msra.mxu0 %v2990_v56 }
  0xe8   : > { %918 = vmatprep.subr.bf16.mxu0 %v2995_v58  ;;  %958 = vmatpush1.bf16.msra.mxu1 %v2998_v59 }
  0xe9   : > { %959 = vmatprep.subr.bf16.mxu1 %v3004_v61 }
  0xeb   : > { %919 = vmatpush1.bf16.msra.mxu0 %v3002_v60  ;;  %v3032_v60 = vld [vmem:[#allocation12 + $0xe8] ss:$16 sps:$4 sm:$0xff]  }
  0xec   : > { %920 = vmatprep.subr.bf16.mxu0 %v3007_v62  ;;  %960 = vmatpush1.bf16.msra.mxu1 %v3010_v63  ;;  %v747_v62 = vpack.c.bf16 %v472_v38, %v472_v38  ;;  %v475_v38 = vld [vmem:[%s2812_s14 + $0x8] sm:$0xff] }
  0xed   : > { %961 = vmatprep.subr.bf16.mxu1 %v3016_v1 }
  0xef   : > { %921 = vmatpush1.bf16.msra.mxu0 %v3014_v0 }
  0xf0   : > { %922 = vmatprep.subr.bf16.mxu0 %v3019_v2  ;;  %962 = vmatpush1.bf16.msra.mxu1 %v3022_v3  ;;  %v3499_v2 = vmov 0  }
  0xf1   : > { %963 = vmatprep.subr.bf16.mxu1 %v3028_v6 }
  0xf3   : > { %923 = vmatpush1.bf16.msra.mxu0 %v3026_v35 }
  0xf4   : > { %1018 = vmatprep.subr.bf16.mxu0 %v2841_v4  ;;  %964 = vmatpush1.bf16.msra.mxu1 %v3032_v60 }
  0xf5   : > { %1059 = vmatprep.subr.bf16.mxu1 %v2851_v8 }
  0xf6   : > { %941 = vmatmul.mubr.bf16.vlgmr.msra.gmra.mrb[4].mxu0 %v747_v62 }
  0xf7   : > { %1019 = vmatpush1.bf16.msra.mxu0 %v2843_v5  ;;  %1050 = vmatprep.mubr.bf16.mxu0 %v3499_v2 }
  0xf8   : > { %1020 = vmatprep.subr.bf16.mxu0 %v2848_v7  ;;  %982 = vmatmul.mubr.bf16.vlgmr.msra.gmra.mrb[4].mxu1 %v747_v62  ;;  %v474_v62 = vld [vmem:[%s2812_s14] sm:$0xff] }
  0xf9   : > { %1060 = vmatpush1.bf16.msra.mxu1 %v2855_v10  ;;  %1091 = vmatprep.mubr.bf16.mxu1 %v3499_v2 }
  0xfa   : > { %1061 = vmatprep.subr.bf16.mxu1 %v2861_v12 }
  0xfb   : > { %1021 = vmatpush1.bf16.msra.mxu0 %v2853_v9 }
  0xfc   : > { %1022 = vmatprep.subr.bf16.mxu0 %v2858_v11 }
  0xfd   : > { %1062 = vmatpush1.bf16.msra.mxu1 %v2864_v13 }
  0xfe   : > { %1063 = vmatprep.subr.bf16.mxu1 %v2873_v16 }
  0xff   : > { %1023 = vmatpush1.bf16.msra.mxu0 %v2868_v14 }
 0x100   : > { %1024 = vmatprep.subr.bf16.mxu0 %v2871_v15 }
 0x101   : > { %1064 = vmatpush1.bf16.msra.mxu1 %v2876_v17 }
 0x102   : > { %1065 = vmatprep.subr.bf16.mxu1 %v2882_v19 }
 0x103   : > { %1025 = vmatpush1.bf16.msra.mxu0 %v2880_v18 }
 0x104   : > { %1026 = vmatprep.subr.bf16.mxu0 %v2885_v20 }
 0x105   : > { %1066 = vmatpush1.bf16.msra.mxu1 %v2890_v22  ;;  %v746_v22 = vld [vmem:[%s2819_s0 + $0x18] sm:$0xff] }
 0x106   : > { %1067 = vmatprep.subr.bf16.mxu1 %v2894_v23 }
 0x107   : > { %1027 = vmatpush1.bf16.msra.mxu0 %v2888_v21 }
 0x108   : > { %1028 = vmatprep.subr.bf16.mxu0 %v2897_v24 }
 0x109   : > { %1068 = vmatpush1.bf16.msra.mxu1 %v2900_v25 }
 0x10a   : > { %1069 = vmatprep.subr.bf16.mxu1 %v2906_v27 }
 0x10b   : > { %1029 = vmatpush1.bf16.msra.mxu0 %v2904_v26 }
 0x10c   : > { %1030 = vmatprep.subr.bf16.mxu0 %v2909_v28 }
 0x10d   : > { %1070 = vmatpush1.bf16.msra.mxu1 %v2914_v30  ;;  %v476_v30 = vld [vmem:[%s2812_s14 + $0x10] sm:$0xff] }
 0x10e   : > { %1071 = vmatprep.subr.bf16.mxu1 %v2918_v31 }
 0x10f   : > { %1031 = vmatpush1.bf16.msra.mxu0 %v2912_v29 }
 0x110   : > { %1032 = vmatprep.subr.bf16.mxu0 %v2921_v32 }
 0x111   : > { %1072 = vmatpush1.bf16.msra.mxu1 %v2926_v34 }
 0x112   : > { %1073 = vmatprep.subr.bf16.mxu1 %v2930_v36 }
 0x113   : > { %1033 = vmatpush1.bf16.msra.mxu0 %v2923_v33 }
 0x114   : > { %1128 = vmatprep.subr.bf16.mxu0 %v2933_v37 }
 0x115   : > { %1074 = vmatpush1.bf16.msra.mxu1 %v2936_v39  ;;  %v477_v39 = vld [vmem:[%s2812_s14 + $0x18] sm:$0xff] }
 0x116   : > { %1169 = vmatprep.subr.bf16.mxu1 %v2942_v41 }
 0x1a9   : > { %v673_v31 = vpop.f32.mrb[0].mxu0  ;;  %v714_v36 = vpop.f32.mrb[0].mxu1 }
 0x1aa   : > { %v721_v28 = vadd.f32 %v673_v31, %v474_v62  ;;  %v675_v29 = vpop.f32.mrb[1].mxu0  ;;  %v723_v33 = vadd.f32 %v714_v36, %v476_v30  ;;  %v716_v25 = vpop.f32.mrb[1].mxu1  ;;  %v471_v30 = vld [vmem:[#allocation3] sm:$0xff] }
 0x1ab   : > { %v722_v32 = vadd.f32 %v675_v29, %v475_v38  ;;  %v677_v26 = vpop.f32.mrb[2].mxu0  ;;  %v718_v37 = vpop.f32.mrb[2].mxu1  ;;  %v724_v21 = vadd.f32 %v716_v25, %v477_v39 }
 0x1ac   : > { %v725_v34 = vmul.f32 0.5, %v721_v28  ;;  %v678_v27 = vpop.f32.mrb[3].mxu0  ;;  %v719_v41 = vpop.f32.mrb[3].mxu1  ;;  %v744_v37 = vld [vmem:[%s2819_s0 + $0x8] sm:$0xff] }
 0x1ad   : > { %v729_v24 = vmul.f32 0.5, %v722_v32  ;;  %v734_v23 = vmul.f32 0.5, %v724_v21 }
 0x1ae   : > { %2166 = vtanh.f32 %v725_v34 }
 0x1af   : > { %2168 = vtanh.f32 %v729_v24 }
 0x1b0   : > { %2170 = vtanh.f32 %v723_v33  ;;  %v743_v33 = vld [vmem:[%s2819_s0] sm:$0xff] }
 0x1b1   : > { %2172 = vtanh.f32 %v734_v23 }
 0x1b8   : > { %v2167_v31 = vpop.eup %2166 }
 0x1b9   : > { %v2169_v62 = vpop.eup %2168  ;;  %v727_v29 = vmul.f32 0.5, %v2167_v31  ;;  %v745_v31 = vld [vmem:[%s2819_s0 + $0x10] sm:$0xff] }
 0x1ba   : > { %v2171_v26 = vpop.eup %2170  ;;  %v731_v28 = vmul.f32 0.5, %v2169_v62 }
 0x1bb   : > { %v728_v27 = vadd.f32 0.5, %v727_v29  ;;  %v2173_v25 = vpop.eup %2172 }
 0x1bc   : > { %v732_v32 = vadd.f32 0.5, %v731_v28  ;;  %v736_v21 = vmul.f32 0.5, %v2173_v25 }
 0x1bd   : > { %v739_v34 = vmul.f32 %v2171_v26, %v728_v27 }
 0x1be   : > { %v738_v36 = vmul.f32 %v732_v32, %v471_v30  ;;  %v737_v62 = vadd.f32 0.5, %v736_v21 }
 0x1c0   : > { %v3077_v24 = vadd.f32 %v739_v34, %v738_v36 }
 0x1c2   : > { %3500 = vst [vmem:[#allocation51_spill] sm:$0xff] %v3077_v24  ;;  %2174 = vtanh.f32 %v3077_v24 }
 0x1c9   : > { %v942_v39 = vpop.f32.mrb[4].mxu0 }
 0x1ca   : > { %v990_v41 = vadd.f32 %v942_v39, %v743_v33  ;;  %v944_v38 = vpop.f32.mrb[5].mxu0 }
 0x1cb   : > { %v991_v23 = vadd.f32 %v944_v38, %v744_v37  ;;  %v946_v29 = vpop.f32.mrb[6].mxu0  ;;  %v983_v27 = vpop.f32.mrb[4].mxu1 }
 0x1cc   : > { %v2175_v20 = vpop.eup %2174  ;;  %v994_v28 = vmul.f32 0.5, %v990_v41  ;;  %v947_v26 = vpop.f32.mrb[7].mxu0  ;;  %v992_v34 = vadd.f32 %v983_v27, %v745_v31  ;;  %v473_v31 = vld [vmem:[#allocation5] sm:$0xff]  ;;  %v3501_v27 = vld [vmem:[#allocation48_spill] sm:$0xff] }
 0x1cd   : > { %v742_v30 = vmul.f32 %v2175_v20, %v737_v62  ;;  %v998_v32 = vmul.f32 0.5, %v991_v23  ;;  %v985_v36 = vpop.f32.mrb[5].mxu1 }
 0x1ce   : > { %2176 = vtanh.f32 %v994_v28  ;;  %v987_v25 = vpop.f32.mrb[6].mxu1  ;;  %v993_v21 = vadd.f32 %v985_v36, %v746_v22  ;;  %v3503_v36 = vld [vmem:[#allocation50_spill] sm:$0xff] }
 0x1cf   : > { %v1017_v24 = vpack.c.bf16 %v742_v30, %v742_v30  ;;  %2178 = vtanh.f32 %v998_v32  ;;  %v988_v33 = vpop.f32.mrb[7].mxu1  ;;  %v3502_v32 = vld [vmem:[#allocation49_spill] sm:$0xff] }
 0x1d0   : > { %2180 = vtanh.f32 %v992_v34  ;;  %v1003_v20 = vmul.f32 0.5, %v993_v21 }
 0x1d1   : > { %1051 = vmatmul.mubr.bf16.vlgmr.msra.gmra.mrb[8].mxu0 %v1017_v24  ;;  %1092 = vmatmul.mubr.bf16.vlgmr.msra.gmra.mrb[8].mxu1 %v1017_v24 }
 0x1d2   : > { %1129 = vmatpush1.bf16.msra.mxu0 %v2938_v40  ;;  %1170 = vmatpush1.bf16.msra.mxu1 %v2948_v43  ;;  %2182 = vtanh.f32 %v1003_v20  ;;  %v3505_v20 = vld [vmem:[#allocation31_spill] sm:$0xff] }
 0x1d3   : > { %1130 = vmatprep.subr.bf16.mxu0 %v2945_v42  ;;  %1171 = vmatprep.subr.bf16.mxu1 %v2954_v45 }
 0x1d4   : > { %1160 = vmatprep.mubr.bf16.mxu0 %v3499_v2  ;;  %1201 = vmatprep.mubr.bf16.mxu1 %v3499_v2 }
 0x1d6   : > { %1131 = vmatpush1.bf16.msra.mxu0 %v2952_v44  ;;  %1172 = vmatpush1.bf16.msra.mxu1 %v2963_v48 }
 0x1d7   : > { %1132 = vmatprep.subr.bf16.mxu0 %v2957_v46  ;;  %1173 = vmatprep.subr.bf16.mxu1 %v2968_v49 }
 0x1d8   : > { %v2177_v22 = vpop.eup %2176 }
 0x1d9   : > { %v2179_v24 = vpop.eup %2178  ;;  %v996_v37 = vmul.f32 0.5, %v2177_v22  ;;  %v3506_v22 = vld [vmem:[#allocation29_spill] sm:$0xff] }
 0x1da   : > { %v2181_v39 = vpop.eup %2180  ;;  %v1000_v41 = vmul.f32 0.5, %v2179_v24  ;;  %1133 = vmatpush1.bf16.msra.mxu0 %v2961_v47  ;;  %1174 = vmatpush1.bf16.msra.mxu1 %v2974_v51  ;;  %v3507_v24 = vld [vmem:[#allocation32_spill] sm:$0xff] }
 0x1db   : > { %v997_v38 = vadd.f32 0.5, %v996_v37  ;;  %1134 = vmatprep.subr.bf16.mxu0 %v2971_v50  ;;  %1175 = vmatprep.subr.bf16.mxu1 %v2980_v53  ;;  %v3508_v37 = vld [vmem:[#allocation30_spill] sm:$0xff] }
 0x1dc   : > { %v1001_v62 = vadd.f32 0.5, %v1000_v41  ;;  %v2183_v26 = vpop.eup %2182  ;;  %v3510_v41 = vld [vmem:[#allocation33_spill] sm:$0xff] }
 0x1dd   : > { %v1008_v23 = vmul.f32 %v2181_v39, %v997_v38  ;;  %v1005_v30 = vmul.f32 0.5, %v2183_v26  ;;  %v3509_v39 = vld [vmem:[#allocation34_spill] sm:$0xff]  ;;  %v3511_v38 = vld [vmem:[#allocation36_spill] sm:$0xff] }
 0x1de   : > { %v1007_v29 = vmul.f32 %v1001_v62, %v473_v31  ;;  %1135 = vmatpush1.bf16.msra.mxu0 %v2978_v52  ;;  %1176 = vmatpush1.bf16.msra.mxu1 %v2986_v55  ;;  %v3512_v31 = vld [vmem:[#allocation35_spill] sm:$0xff]  ;;  %v3516_v26 = vld [vmem:[#allocation38_spill] sm:$0xff] }
 0x1df   : > { %1136 = vmatprep.subr.bf16.mxu0 %v2983_v54  ;;  %1177 = vmatprep.subr.bf16.mxu1 %v2992_v57  ;;  %v1006_v34 = vadd.f32 0.5, %v1005_v30  ;;  %v3513_v62 = vld [vmem:[#allocation39_spill] sm:$0xff] }
 0x1e0   : > { %v3102_v28 = vadd.f32 %v1008_v23, %v1007_v29  ;;  %v3514_v23 = vld [vmem:[#allocation37_spill] sm:$0xff]  ;;  %v3515_v29 = vld [vmem:[#allocation40_spill] sm:$0xff]  ;;  %v3517_v30 = vld [vmem:[#allocation43_spill] sm:$0xff] }
 0x1e2   : > { %2184 = vtanh.f32 %v3102_v28  ;;  %1137 = vmatpush1.bf16.msra.mxu0 %v2990_v56  ;;  %1178 = vmatpush1.bf16.msra.mxu1 %v2998_v59 }
 0x1e3   : > { %1138 = vmatprep.subr.bf16.mxu0 %v2995_v58  ;;  %1179 = vmatprep.subr.bf16.mxu1 %v3004_v61 }
 0x1e6   : > { %1139 = vmatpush1.bf16.msra.mxu0 %v3501_v27  ;;  %1180 = vmatpush1.bf16.msra.mxu1 %v3010_v63 }
 0x1e7   : > { %1140 = vmatprep.subr.bf16.mxu0 %v3502_v32  ;;  %1181 = vmatprep.subr.bf16.mxu1 %v3016_v1 }
 0x1ea   : > { %1141 = vmatpush1.bf16.msra.mxu0 %v3014_v0  ;;  %1182 = vmatpush1.bf16.msra.mxu1 %v3022_v3 }
 0x1eb   : > { %1142 = vmatprep.subr.bf16.mxu0 %v3503_v36  ;;  %1183 = vmatprep.subr.bf16.mxu1 %v3028_v6 }
 0x1ec   : > { %v2185_v25 = vpop.eup %2184 }
 0x1ed   : > { %v3117_v33 = vmul.f32 %v2185_v25, %v1006_v34  ;;  %v3518_v34 = vld [vmem:[#allocation41_spill] sm:$0xff]  ;;  %v3519_v25 = vld [vmem:[#allocation44_spill] sm:$0xff] }
 0x1ee   : > { %1143 = vmatpush1.bf16.msra.mxu0 %v3026_v35  ;;  %1184 = vmatpush1.bf16.msra.mxu1 %v3032_v60 }
 0x1ef   : > { %3504 = vst [vmem:[#allocation48_spill] sm:$0xff] %v3117_v33  ;;  %v1127_v21 = vpack.c.bf16 %v3117_v33, %v3117_v33  ;;  %1238 = vmatprep.subr.bf16.mxu0 %v2841_v4  ;;  %1279 = vmatprep.subr.bf16.mxu1 %v2851_v8  ;;  %v3521_v33 = vld [vmem:[#allocation46_spill] sm:$0xff] }
 0x1f1   : > { %1161 = vmatmul.mubr.bf16.vlgmr.msra.gmra.mrb[12].mxu0 %v1127_v21  ;;  %1202 = vmatmul.mubr.bf16.vlgmr.msra.gmra.mrb[12].mxu1 %v1127_v21  ;;  %v3520_v21 = vld [vmem:[#allocation42_spill] sm:$0xff] }
 0x1f2   : > { %1239 = vmatpush1.bf16.msra.mxu0 %v2843_v5  ;;  %1280 = vmatpush1.bf16.msra.mxu1 %v2855_v10 }
 0x1f3   : > { %1240 = vmatprep.subr.bf16.mxu0 %v2848_v7  ;;  %1281 = vmatprep.subr.bf16.mxu1 %v2861_v12 }
 0x1f4   : > { %1270 = vmatprep.mubr.bf16.mxu0 %v3499_v2  ;;  %1311 = vmatprep.mubr.bf16.mxu1 %v3499_v2 }
 0x1f6   : > { %1241 = vmatpush1.bf16.msra.mxu0 %v2853_v9  ;;  %1282 = vmatpush1.bf16.msra.mxu1 %v2864_v13 }
 0x1f7   : > { %1242 = vmatprep.subr.bf16.mxu0 %v2858_v11  ;;  %1283 = vmatprep.subr.bf16.mxu1 %v2873_v16 }
 0x1fa   : > { %1243 = vmatpush1.bf16.msra.mxu0 %v2868_v14  ;;  %1284 = vmatpush1.bf16.msra.mxu1 %v2876_v17 }
 0x1fb   : > { %1244 = vmatprep.subr.bf16.mxu0 %v2871_v15  ;;  %1285 = vmatprep.subr.bf16.mxu1 %v2882_v19 }
 0x1fe   : > { %1245 = vmatpush1.bf16.msra.mxu0 %v2880_v18  ;;  %1286 = vmatpush1.bf16.msra.mxu1 %v3505_v20 }
 0x1ff   : > { %1246 = vmatprep.subr.bf16.mxu0 %v3506_v22  ;;  %1287 = vmatprep.subr.bf16.mxu1 %v3507_v24 }
 0x202   : > { %1247 = vmatpush1.bf16.msra.mxu0 %v3508_v37  ;;  %1288 = vmatpush1.bf16.msra.mxu1 %v3509_v39  ;;  %v1931_v37 = vld [vmem:[%s2812_s14 + $0x30] sm:$0xff] }
 0x203   : > { %1248 = vmatprep.subr.bf16.mxu0 %v3510_v41  ;;  %1289 = vmatprep.subr.bf16.mxu1 %v3511_v38  ;;  %v1930_v38 = vld [vmem:[%s2812_s14 + $0x28] sm:$0xff] }
 0x206   : > { %1249 = vmatpush1.bf16.msra.mxu0 %v3512_v31  ;;  %1290 = vmatpush1.bf16.msra.mxu1 %v3513_v62  ;;  %v3522_v31 = vld [vmem:[#allocation45_spill] sm:$0xff]  ;;  %v3523_v62 = vld [vmem:[#allocation47_spill] sm:$0xff] }
 0x207   : > { %1250 = vmatprep.subr.bf16.mxu0 %v3514_v23  ;;  %1291 = vmatprep.subr.bf16.mxu1 %v3515_v29  ;;  %v1929_v23 = vld [vmem:[%s2812_s14 + $0x20] sm:$0xff] }
 0x20a   : > { %1251 = vmatpush1.bf16.msra.mxu0 %v3516_v26  ;;  %1292 = vmatpush1.bf16.msra.mxu1 %v3517_v30 }
 0x20b   : > { %1252 = vmatprep.subr.bf16.mxu0 %v3518_v34  ;;  %1293 = vmatprep.subr.bf16.mxu1 %v3519_v25 }
 0x20e   : > { %1253 = vmatpush1.bf16.msra.mxu0 %v3520_v21  ;;  %1294 = vmatpush1.bf16.msra.mxu1 %v3521_v33 }
 0x20f   : > { %1348 = vmatprep.subr.bf16.mxu0 %v3522_v31  ;;  %1389 = vmatprep.subr.bf16.mxu1 %v3523_v62  ;;  %v1932_v62 = vld [vmem:[%s2812_s14 + $0x38] sm:$0xff] }
 0x2a4   : > { %v1052_v29 = vpop.f32.mrb[8].mxu0  ;;  %v1093_v41 = vpop.f32.mrb[8].mxu1 }
 0x2a5   : > { %v1100_v26 = vadd.f32 %v1929_v23, %v1052_v29  ;;  %v1054_v39 = vpop.f32.mrb[9].mxu0  ;;  %v1095_v30 = vpop.f32.mrb[9].mxu1  ;;  %v1102_v31 = vadd.f32 %v1931_v37, %v1093_v41 }
 0x2a6   : > { %v1101_v34 = vadd.f32 %v1930_v38, %v1054_v39  ;;  %v1056_v24 = vpop.f32.mrb[10].mxu0  ;;  %v1097_v25 = vpop.f32.mrb[10].mxu1  ;;  %v1103_v18 = vadd.f32 %v1932_v62, %v1095_v30 }
 0x2a7   : > { %v1104_v22 = vmul.f32 0.5, %v1100_v26  ;;  %v1057_v21 = vpop.f32.mrb[11].mxu0  ;;  %v1098_v20 = vpop.f32.mrb[11].mxu1  ;;  %v3524_v26 = vld [vmem:[#allocation51_spill] sm:$0xff] }
 0x2a8   : > { %v1108_v33 = vmul.f32 0.5, %v1101_v34  ;;  %v1113_v19 = vmul.f32 0.5, %v1103_v18  ;;  %v1933_v18 = vld [vmem:[%s2819_s0 + $0x20] sm:$0xff]  ;;  %v1935_v21 = vld [vmem:[%s2819_s0 + $0x30] sm:$0xff] }
 0x2a9   : > { %2186 = vtanh.f32 %v1104_v22 }
 0x2aa   : > { %2188 = vtanh.f32 %v1108_v33 }
 0x2ab   : > { %2190 = vtanh.f32 %v1102_v31  ;;  %v1934_v31 = vld [vmem:[%s2819_s0 + $0x28] sm:$0xff] }
 0x2ac   : > { %2192 = vtanh.f32 %v1113_v19 }
 0x2b3   : > { %v2187_v23 = vpop.eup %2186 }
 0x2b4   : > { %v2189_v29 = vpop.eup %2188  ;;  %v1106_v15 = vmul.f32 0.5, %v2187_v23 }
 0x2b5   : > { %v1110_v17 = vmul.f32 0.5, %v2189_v29  ;;  %v2191_v39 = vpop.eup %2190 }
 0x2b6   : > { %v1107_v24 = vadd.f32 0.5, %v1106_v15  ;;  %v2193_v33 = vpop.eup %2192 }
 0x2b7   : > { %v1111_v38 = vadd.f32 0.5, %v1110_v17  ;;  %v1115_v41 = vmul.f32 0.5, %v2193_v33 }
 0x2b8   : > { %v1118_v20 = vmul.f32 %v2191_v39, %v1107_v24 }
 0x2b9   : > { %v1117_v22 = vmul.f32 %v1111_v38, %v3524_v26  ;;  %v1116_v15 = vadd.f32 0.5, %v1115_v41 }
 0x2bb   : > { %v3164_v37 = vadd.f32 %v1118_v20, %v1117_v22 }
 0x2bd   : > { %2194 = vtanh.f32 %v3164_v37 }
 0x2c4   : > { %v1162_v62 = vpop.f32.mrb[12].mxu0  ;;  %v1203_v30 = vpop.f32.mrb[12].mxu1 }
 0x2c5   : > { %v1210_v34 = vadd.f32 %v1933_v18, %v1162_v62  ;;  %v1164_v25 = vpop.f32.mrb[13].mxu0  ;;  %v1205_v19 = vpop.f32.mrb[13].mxu1  ;;  %v1212_v33 = vadd.f32 %v1935_v21, %v1203_v30  ;;  %v1936_v62 = vld [vmem:[%s2819_s0 + $0x38] sm:$0xff] }
 0x2c6   : > { %v1211_v17 = vadd.f32 %v1934_v31, %v1164_v25  ;;  %v1166_v23 = vpop.f32.mrb[14].mxu0  ;;  %v1207_v29 = vpop.f32.mrb[14].mxu1  ;;  %v1213_v41 = vadd.f32 %v1936_v62, %v1205_v19  ;;  %v3537_v62 = vld [vmem:[#allocation39_spill] sm:$0xff] }
 0x2c7   : > { %v2195_v24 = vpop.eup %2194  ;;  %v1214_v39 = vmul.f32 0.5, %v1210_v34  ;;  %v1167_v38 = vpop.f32.mrb[15].mxu0 }
 0x2c8   : > { %v1208_v20 = vpop.f32.mrb[15].mxu1  ;;  %v3170_v26 = vmul.f32 %v2195_v24, %v1116_v15  ;;  %v1218_v22 = vmul.f32 0.5, %v1211_v17  ;;  %v1223_v31 = vmul.f32 0.5, %v1213_v41  ;;  %v3538_v41 = vld [vmem:[#allocation37_spill] sm:$0xff] }
 0x2c9   : > { %2196 = vtanh.f32 %v1214_v39 }
 0x2ca   : > { %v1237_v18 = vpack.c.bf16 %v3170_v26, %v3170_v26  ;;  %2198 = vtanh.f32 %v1218_v22 }
 0x2cb   : > { %2200 = vtanh.f32 %v1212_v33 }
 0x2cc   : > { %1271 = vmatmul.mubr.bf16.vlgmr.msra.gmra.mrb[16].mxu0 %v1237_v18  ;;  %1312 = vmatmul.mubr.bf16.vlgmr.msra.gmra.mrb[16].mxu1 %v1237_v18  ;;  %2202 = vtanh.f32 %v1223_v31  ;;  %v3536_v18 = vld [vmem:[#allocation35_spill] sm:$0xff]  ;;  %v3539_v31 = vld [vmem:[#allocation40_spill] sm:$0xff] }
 0x2cd   : > { %1349 = vmatpush1.bf16.msra.mxu0 %v2938_v40  ;;  %1390 = vmatpush1.bf16.msra.mxu1 %v2948_v43 }
 0x2ce   : > { %1350 = vmatprep.subr.bf16.mxu0 %v2945_v42  ;;  %1391 = vmatprep.subr.bf16.mxu1 %v2954_v45 }
 0x2cf   : > { %1380 = vmatprep.mubr.bf16.mxu0 %v3499_v2  ;;  %1421 = vmatprep.mubr.bf16.mxu1 %v3499_v2 }
 0x2d1   : > { %1351 = vmatpush1.bf16.msra.mxu0 %v2952_v44  ;;  %1392 = vmatpush1.bf16.msra.mxu1 %v2963_v48 }
 0x2d2   : > { %1352 = vmatprep.subr.bf16.mxu0 %v2957_v46  ;;  %1393 = vmatprep.subr.bf16.mxu1 %v2968_v49 }
 0x2d3   : > { %v2197_v30 = vpop.eup %2196 }
 0x2d4   : > { %v2199_v34 = vpop.eup %2198  ;;  %v1216_v25 = vmul.f32 0.5, %v2197_v30  ;;  %v3540_v30 = vld [vmem:[#allocation38_spill] sm:$0xff] }
 0x2d5   : > { %v1220_v19 = vmul.f32 0.5, %v2199_v34  ;;  %1353 = vmatpush1.bf16.msra.mxu0 %v2961_v47  ;;  %1394 = vmatpush1.bf16.msra.mxu1 %v2974_v51  ;;  %v2201_v21 = vpop.eup %2200  ;;  %v3541_v34 = vld [vmem:[#allocation43_spill] sm:$0xff] }
 0x2d6   : > { %v1217_v15 = vadd.f32 0.5, %v1216_v25  ;;  %1354 = vmatprep.subr.bf16.mxu0 %v2971_v50  ;;  %1395 = vmatprep.subr.bf16.mxu1 %v2980_v53  ;;  %v3542_v25 = vld [vmem:[#allocation41_spill] sm:$0xff] }
 0x2d7   : > { %v1221_v17 = vadd.f32 0.5, %v1220_v19  ;;  %v3543_v19 = vld [vmem:[#allocation44_spill] sm:$0xff] }
 0x2d8   : > { %v1228_v23 = vmul.f32 %v2201_v21, %v1217_v15  ;;  %v3544_v15 = vld [vmem:[#allocation42_spill] sm:$0xff] }
 0x2d9   : > { %v1227_v29 = vmul.f32 %v1221_v17, %v3102_v28  ;;  %1355 = vmatpush1.bf16.msra.mxu0 %v2978_v52  ;;  %1396 = vmatpush1.bf16.msra.mxu1 %v2986_v55  ;;  %v2203_v28 = vpop.eup %2202  ;;  %v3545_v21 = vld [vmem:[#allocation46_spill] sm:$0xff]  ;;  %v3546_v17 = vld [vmem:[#allocation45_spill] sm:$0xff] }
 0x2da   : > { %1356 = vmatprep.subr.bf16.mxu0 %v2983_v54  ;;  %1397 = vmatprep.subr.bf16.mxu1 %v2992_v57  ;;  %v1225_v39 = vmul.f32 0.5, %v2203_v28  ;;  %v1938_v28 = vld [vmem:[%s2812_s14 + $0x48] sm:$0xff] }
 0x2db   : > { %v3194_v24 = vadd.f32 %v1228_v23, %v1227_v29  ;;  %v3547_v23 = vld [vmem:[#allocation47_spill] sm:$0xff]  ;;  %v1937_v29 = vld [vmem:[%s2812_s14 + $0x40] sm:$0xff] }
 0x2dc   : > { %v1226_v38 = vadd.f32 0.5, %v1225_v39 }
 0x2dd   : > { %2204 = vtanh.f32 %v3194_v24  ;;  %1357 = vmatpush1.bf16.msra.mxu0 %v2990_v56  ;;  %1398 = vmatpush1.bf16.msra.mxu1 %v2998_v59 }
 0x2de   : > { %1358 = vmatprep.subr.bf16.mxu0 %v2995_v58  ;;  %1399 = vmatprep.subr.bf16.mxu1 %v3004_v61 }
 0x2e1   : > { %1359 = vmatpush1.bf16.msra.mxu0 %v3501_v27  ;;  %1400 = vmatpush1.bf16.msra.mxu1 %v3010_v63 }
 0x2e2   : > { %1360 = vmatprep.subr.bf16.mxu0 %v3502_v32  ;;  %1401 = vmatprep.subr.bf16.mxu1 %v3016_v1 }
 0x2e5   : > { %1361 = vmatpush1.bf16.msra.mxu0 %v3014_v0  ;;  %1402 = vmatpush1.bf16.msra.mxu1 %v3022_v3 }
 0x2e6   : > { %1362 = vmatprep.subr.bf16.mxu0 %v3503_v36  ;;  %1403 = vmatprep.subr.bf16.mxu1 %v3028_v6 }
 0x2e7   : > { %v2205_v20 = vpop.eup %2204 }
 0x2e8   : > { %v3209_v22 = vmul.f32 %v2205_v20, %v1226_v38 }
 0x2e9   : > { %1363 = vmatpush1.bf16.msra.mxu0 %v3026_v35  ;;  %1404 = vmatpush1.bf16.msra.mxu1 %v3032_v60 }
 0x2ea   : > { %v1347_v33 = vpack.c.bf16 %v3209_v22, %v3209_v22  ;;  %1458 = vmatprep.subr.bf16.mxu0 %v2841_v4  ;;  %1499 = vmatprep.subr.bf16.mxu1 %v2851_v8  ;;  %v3525_v4 = vld [vmem:[#allocation26_spill] sm:$0xff]  ;;  %v3528_v8 = vld [vmem:[#allocation27_spill] sm:$0xff] }
 0x2ec   : > { %1381 = vmatmul.mubr.bf16.vlgmr.msra.gmra.mrb[20].mxu0 %v1347_v33  ;;  %1422 = vmatmul.mubr.bf16.vlgmr.msra.gmra.mrb[20].mxu1 %v1347_v33 }
 0x2ed   : > { %1459 = vmatpush1.bf16.msra.mxu0 %v2843_v5  ;;  %1500 = vmatpush1.bf16.msra.mxu1 %v2855_v10  ;;  %v3526_v5 = vld [vmem:[#allocation25_spill] sm:$0xff]  ;;  %v3529_v10 = vld [vmem:[#allocation31_spill] sm:$0xff] }
 0x2ee   : > { %1460 = vmatprep.subr.bf16.mxu0 %v2848_v7  ;;  %1501 = vmatprep.subr.bf16.mxu1 %v2861_v12  ;;  %v3527_v7 = vld [vmem:[#allocation28_spill] sm:$0xff]  ;;  %v3530_v12 = vld [vmem:[#allocation29_spill] sm:$0xff] }
 0x2ef   : > { %1490 = vmatprep.mubr.bf16.mxu0 %v3499_v2  ;;  %1531 = vmatprep.mubr.bf16.mxu1 %v3499_v2 }
 0x2f1   : > { %1461 = vmatpush1.bf16.msra.mxu0 %v2853_v9  ;;  %1502 = vmatpush1.bf16.msra.mxu1 %v2864_v13  ;;  %v3531_v9 = vld [vmem:[#allocation32_spill] sm:$0xff]  ;;  %v3532_v13 = vld [vmem:[#allocation30_spill] sm:$0xff] }
 0x2f2   : > { %1462 = vmatprep.subr.bf16.mxu0 %v2858_v11  ;;  %1503 = vmatprep.subr.bf16.mxu1 %v2873_v16  ;;  %v3533_v11 = vld [vmem:[#allocation34_spill] sm:$0xff]  ;;  %v3535_v16 = vld [vmem:[#allocation36_spill] sm:$0xff] }
 0x2f5   : > { %1463 = vmatpush1.bf16.msra.mxu0 %v2868_v14  ;;  %1504 = vmatpush1.bf16.msra.mxu1 %v3525_v4  ;;  %v3534_v14 = vld [vmem:[#allocation33_spill] sm:$0xff] }
 0x2f6   : > { %1464 = vmatprep.subr.bf16.mxu0 %v3526_v5  ;;  %1505 = vmatprep.subr.bf16.mxu1 %v3527_v7  ;;  %v1939_v5 = vld [vmem:[%s2812_s14 + $0x50] sm:$0xff] }
 0x2f9   : > { %1465 = vmatpush1.bf16.msra.mxu0 %v3528_v8  ;;  %1506 = vmatpush1.bf16.msra.mxu1 %v3529_v10 }
 0x2fa   : > { %1466 = vmatprep.subr.bf16.mxu0 %v3530_v12  ;;  %1507 = vmatprep.subr.bf16.mxu1 %v3531_v9 }
 0x2fd   : > { %1467 = vmatpush1.bf16.msra.mxu0 %v3532_v13  ;;  %1508 = vmatpush1.bf16.msra.mxu1 %v3533_v11 }
 0x2fe   : > { %1468 = vmatprep.subr.bf16.mxu0 %v3534_v14  ;;  %1509 = vmatprep.subr.bf16.mxu1 %v3535_v16  ;;  %v1940_v16 = vld [vmem:[%s2812_s14 + $0x58] sm:$0xff] }
 0x301   : > { %1469 = vmatpush1.bf16.msra.mxu0 %v3536_v18  ;;  %1510 = vmatpush1.bf16.msra.mxu1 %v3537_v62 }
 0x302   : > { %1470 = vmatprep.subr.bf16.mxu0 %v3538_v41  ;;  %1511 = vmatprep.subr.bf16.mxu1 %v3539_v31 }
 0x305   : > { %1471 = vmatpush1.bf16.msra.mxu0 %v3540_v30  ;;  %1512 = vmatpush1.bf16.msra.mxu1 %v3541_v34 }
 0x306   : > { %1472 = vmatprep.subr.bf16.mxu0 %v3542_v25  ;;  %1513 = vmatprep.subr.bf16.mxu1 %v3543_v19 }
 0x309   : > { %1473 = vmatpush1.bf16.msra.mxu0 %v3544_v15  ;;  %1514 = vmatpush1.bf16.msra.mxu1 %v3545_v21 }
 0x30a   : > { %1568 = vmatprep.subr.bf16.mxu0 %v3546_v17  ;;  %1609 = vmatprep.subr.bf16.mxu1 %v3547_v23 }
 0x39f   : > { %v1272_v39 = vpop.f32.mrb[16].mxu0  ;;  %v1313_v38 = vpop.f32.mrb[16].mxu1 }
 0x3a0   : > { %v1320_v20 = vadd.f32 %v1937_v29, %v1272_v39  ;;  %v1274_v33 = vpop.f32.mrb[17].mxu0  ;;  %v1315_v4 = vpop.f32.mrb[17].mxu1  ;;  %v1322_v14 = vadd.f32 %v1939_v5, %v1313_v38  ;;  %v1941_v39 = vld [vmem:[%s2819_s0 + $0x40] sm:$0xff]  ;;  %v1942_v38 = vld [vmem:[%s2819_s0 + $0x48] sm:$0xff] }
 0x3a1   : > { %v1321_v7 = vadd.f32 %v1938_v28, %v1274_v33  ;;  %v1276_v8 = vpop.f32.mrb[18].mxu0  ;;  %v1317_v10 = vpop.f32.mrb[18].mxu1  ;;  %v1323_v18 = vadd.f32 %v1940_v16, %v1315_v4 }
 0x3a2   : > { %v1324_v12 = vmul.f32 0.5, %v1320_v20  ;;  %v1277_v9 = vpop.f32.mrb[19].mxu0  ;;  %v1318_v13 = vpop.f32.mrb[19].mxu1  ;;  %v1943_v10 = vld [vmem:[%s2819_s0 + $0x50] sm:$0xff] }
 0x3a3   : > { %v1328_v11 = vmul.f32 0.5, %v1321_v7  ;;  %v1333_v62 = vmul.f32 0.5, %v1323_v18 }
 0x3a4   : > { %2206 = vtanh.f32 %v1324_v12 }
 0x3a5   : > { %2208 = vtanh.f32 %v1328_v11 }
 0x3a6   : > { %2210 = vtanh.f32 %v1322_v14 }
 0x3a7   : > { %2212 = vtanh.f32 %v1333_v62 }
 0x3ae   : > { %v2207_v41 = vpop.eup %2206 }
 0x3af   : > { %v2209_v31 = vpop.eup %2208  ;;  %v1326_v30 = vmul.f32 0.5, %v2207_v41 }
 0x3b0   : > { %v1330_v34 = vmul.f32 0.5, %v2209_v31  ;;  %v2211_v19 = vpop.eup %2210 }
 0x3b1   : > { %v1327_v25 = vadd.f32 0.5, %v1326_v30  ;;  %v2213_v29 = vpop.eup %2212 }
 0x3b2   : > { %v1331_v15 = vadd.f32 0.5, %v1330_v34  ;;  %v1335_v28 = vmul.f32 0.5, %v2213_v29  ;;  %v1944_v34 = vld [vmem:[%s2819_s0 + $0x58] sm:$0xff] }
 0x3b3   : > { %v1338_v21 = vmul.f32 %v2211_v19, %v1327_v25 }
 0x3b4   : > { %v1337_v17 = vmul.f32 %v1331_v15, %v3164_v37  ;;  %v1336_v8 = vadd.f32 0.5, %v1335_v28 }
 0x3b6   : > { %v3256_v23 = vadd.f32 %v1338_v21, %v1337_v17 }
 0x3b8   : > { %2214 = vtanh.f32 %v3256_v23 }
 0x3bf   : > { %v1382_v20 = vpop.f32.mrb[20].mxu0  ;;  %v1423_v33 = vpop.f32.mrb[20].mxu1 }
 0x3c0   : > { %v1430_v4 = vadd.f32 %v1941_v39, %v1382_v20  ;;  %v1384_v5 = vpop.f32.mrb[21].mxu0  ;;  %v1425_v7 = vpop.f32.mrb[21].mxu1  ;;  %v1432_v31 = vadd.f32 %v1943_v10, %v1423_v33 }
 0x3c1   : > { %v1431_v12 = vadd.f32 %v1942_v38, %v1384_v5  ;;  %v1386_v9 = vpop.f32.mrb[22].mxu0  ;;  %v1427_v13 = vpop.f32.mrb[22].mxu1  ;;  %v1433_v25 = vadd.f32 %v1944_v34, %v1425_v7 }
 0x3c2   : > { %v2215_v11 = vpop.eup %2214  ;;  %v1434_v14 = vmul.f32 0.5, %v1430_v4  ;;  %v1387_v16 = vpop.f32.mrb[23].mxu0  ;;  %v1949_v13 = vld [vmem:[%s2819_s0 + $0x60] sm:$0xff] }
 0x3c3   : > { %v1428_v18 = vpop.f32.mrb[23].mxu1  ;;  %v1341_v62 = vmul.f32 %v2215_v11, %v1336_v8  ;;  %v1438_v41 = vmul.f32 0.5, %v1431_v12  ;;  %v1443_v19 = vmul.f32 0.5, %v1433_v25  ;;  %v1950_v11 = vld [vmem:[%s2819_s0 + $0x68] sm:$0xff] }
 0x3c4   : > { %2216 = vtanh.f32 %v1434_v14 }
 0x3c5   : > { %v1457_v30 = vpack.c.bf16 %v1341_v62, %v1341_v62  ;;  %2218 = vtanh.f32 %v1438_v41 }
 0x3c6   : > { %2220 = vtanh.f32 %v1432_v31 }
 0x3c7   : > { %1491 = vmatmul.mubr.bf16.vlgmr.msra.gmra.mrb[24].mxu0 %v1457_v30  ;;  %1532 = vmatmul.mubr.bf16.vlgmr.msra.gmra.mrb[24].mxu1 %v1457_v30  ;;  %2222 = vtanh.f32 %v1443_v19  ;;  %v1951_v30 = vld [vmem:[%s2819_s0 + $0x70] sm:$0xff] }
 0x3c8   : > { %1569 = vmatpush1.bf16.msra.mxu0 %v2938_v40  ;;  %1610 = vmatpush1.bf16.msra.mxu1 %v2948_v43 }
 0x3c9   : > { %1570 = vmatprep.subr.bf16.mxu0 %v2945_v42  ;;  %1611 = vmatprep.subr.bf16.mxu1 %v2954_v45 }
 0x3ca   : > { %1600 = vmatprep.mubr.bf16.mxu0 %v3499_v2  ;;  %1641 = vmatprep.mubr.bf16.mxu1 %v3499_v2 }
 0x3cc   : > { %1571 = vmatpush1.bf16.msra.mxu0 %v2952_v44  ;;  %1612 = vmatpush1.bf16.msra.mxu1 %v2963_v48 }
 0x3cd   : > { %1572 = vmatprep.subr.bf16.mxu0 %v2957_v46  ;;  %1613 = vmatprep.subr.bf16.mxu1 %v2968_v49 }
 0x3ce   : > { %v2217_v40 = vpop.eup %2216 }
 0x3cf   : > { %v2219_v15 = vpop.eup %2218  ;;  %v1436_v43 = vmul.f32 0.5, %v2217_v40 }
 0x3d0   : > { %v1440_v21 = vmul.f32 0.5, %v2219_v15  ;;  %1573 = vmatpush1.bf16.msra.mxu0 %v2961_v47  ;;  %1614 = vmatpush1.bf16.msra.mxu1 %v2974_v51  ;;  %v2221_v44 = vpop.eup %2220 }
 0x3d1   : > { %v1437_v42 = vadd.f32 0.5, %v1436_v43  ;;  %1574 = vmatprep.subr.bf16.mxu0 %v2971_v50  ;;  %1615 = vmatprep.subr.bf16.mxu1 %v2980_v53  ;;  %v2223_v49 = vpop.eup %2222 }
 0x3d2   : > { %v1441_v45 = vadd.f32 0.5, %v1440_v21  ;;  %v1445_v50 = vmul.f32 0.5, %v2223_v49 }
 0x3d3   : > { %v1448_v48 = vmul.f32 %v2221_v44, %v1437_v42 }
 0x3d4   : > { %v1447_v46 = vmul.f32 %v1441_v45, %v3194_v24  ;;  %1575 = vmatpush1.bf16.msra.mxu0 %v2978_v52  ;;  %1616 = vmatpush1.bf16.msra.mxu1 %v2986_v55  ;;  %v1446_v51 = vadd.f32 0.5, %v1445_v50  ;;  %v1945_v55 = vld [vmem:[%s2812_s14 + $0x60] sm:$0xff]  ;;  %v1952_v45 = vld [vmem:[%s2819_s0 + $0x78] sm:$0xff] }
 0x3d5   : > { %1576 = vmatprep.subr.bf16.mxu0 %v2983_v54  ;;  %1617 = vmatprep.subr.bf16.mxu1 %v2992_v57 }
 0x3d6   : > { %v3282_v47 = vadd.f32 %v1448_v48, %v1447_v46 }
 0x3d8   : > { %2224 = vtanh.f32 %v3282_v47  ;;  %1577 = vmatpush1.bf16.msra.mxu0 %v2990_v56  ;;  %1618 = vmatpush1.bf16.msra.mxu1 %v2998_v59  ;;  %v1946_v56 = vld [vmem:[%s2812_s14 + $0x68] sm:$0xff] }
 0x3d9   : > { %1578 = vmatprep.subr.bf16.mxu0 %v2995_v58  ;;  %1619 = vmatprep.subr.bf16.mxu1 %v3004_v61 }
 0x3dc   : > { %1579 = vmatpush1.bf16.msra.mxu0 %v3501_v27  ;;  %1620 = vmatpush1.bf16.msra.mxu1 %v3010_v63 }
 0x3dd   : > { %1580 = vmatprep.subr.bf16.mxu0 %v3502_v32  ;;  %1621 = vmatprep.subr.bf16.mxu1 %v3016_v1 }
 0x3e0   : > { %1581 = vmatpush1.bf16.msra.mxu0 %v3014_v0  ;;  %1622 = vmatpush1.bf16.msra.mxu1 %v3022_v3  ;;  %v1947_v0 = vld [vmem:[%s2812_s14 + $0x70] sm:$0xff] }
 0x3e1   : > { %1582 = vmatprep.subr.bf16.mxu0 %v3503_v36  ;;  %1623 = vmatprep.subr.bf16.mxu1 %v3028_v6  ;;  %v1948_v36 = vld [vmem:[%s2812_s14 + $0x78] sm:$0xff] }
 0x3e2   : > { %v2225_v52 = vpop.eup %2224 }
 0x3e3   : > { %v1451_v53 = vmul.f32 %v2225_v52, %v1446_v51 }
 0x3e4   : > { %1583 = vmatpush1.bf16.msra.mxu0 %v3026_v35  ;;  %1624 = vmatpush1.bf16.msra.mxu1 %v3032_v60 }
 0x3e5   : > { %v1567_v54 = vpack.c.bf16 %v1451_v53, %v1451_v53 }
 0x3e7   : > { %1601 = vmatmul.mubr.bf16.vlgmr.msra.gmra.mrb[28].mxu0 %v1567_v54  ;;  %1642 = vmatmul.mubr.bf16.vlgmr.msra.gmra.mrb[28].mxu1 %v1567_v54 }
 0x49a   : > { %v1492_v57 = vpop.f32.mrb[24].mxu0  ;;  %v1533_v58 = vpop.f32.mrb[24].mxu1 }
 0x49b   : > { %v1540_v59 = vadd.f32 %v1945_v55, %v1492_v57  ;;  %v1494_v61 = vpop.f32.mrb[25].mxu0  ;;  %v1535_v63 = vpop.f32.mrb[25].mxu1  ;;  %v1542_v60 = vadd.f32 %v1947_v0, %v1533_v58 }
 0x49c   : > { %v1541_v1 = vadd.f32 %v1946_v56, %v1494_v61  ;;  %v1496_v6 = vpop.f32.mrb[26].mxu0  ;;  %v1537_v2 = vpop.f32.mrb[26].mxu1  ;;  %v1543_v17 = vadd.f32 %v1948_v36, %v1535_v63 }
 0x49d   : > { %v1544_v3 = vmul.f32 0.5, %v1540_v59  ;;  %v1497_v27 = vpop.f32.mrb[27].mxu0  ;;  %v1538_v35 = vpop.f32.mrb[27].mxu1  ;;  %v3549_v6 = vld [vmem:[#allocation48_spill] sm:$0xff] (!%p3548_p3) }
 0x49e   : > { %v1548_v32 = vmul.f32 0.5, %v1541_v1  ;;  %v1553_v29 = vmul.f32 0.5, %v1543_v17  ;;  %1679 = vst [vmem:[#allocation18] sm:$0xff] (!%p3548_p3), %v3549_v6 }
 0x49f   : > { %2226 = vtanh.f32 %v1544_v3 }
 0x4a0   : > { %2228 = vtanh.f32 %v1548_v32 }
 0x4a1   : > { %2230 = vtanh.f32 %v1542_v60 }
 0x4a2   : > { %2232 = vtanh.f32 %v1553_v29 }
 0x4a9   : > { %v2227_v28 = vpop.eup %2226 }
 0x4aa   : > { %v2229_v39 = vpop.eup %2228  ;;  %v1546_v38 = vmul.f32 0.5, %v2227_v28 }
 0x4ab   : > { %v1550_v20 = vmul.f32 0.5, %v2229_v39  ;;  %v2231_v4 = vpop.eup %2230 }
 0x4ac   : > { %v1547_v33 = vadd.f32 0.5, %v1546_v38  ;;  %v2233_v12 = vpop.eup %2232 }
 0x4ad   : > { %v1551_v5 = vadd.f32 0.5, %v1550_v20  ;;  %v1555_v9 = vmul.f32 0.5, %v2233_v12 }
 0x4ae   : > { %v1558_v7 = vmul.f32 %v2231_v4, %v1547_v33 }
 0x4af   : > { %v1557_v8 = vmul.f32 %v1551_v5, %v3256_v23  ;;  %v1556_v31 = vadd.f32 0.5, %v1555_v9 }
 0x4b1   : > { %v1559_v10 = vadd.f32 %v1558_v7, %v1557_v8 }
 0x4b3   : > { %2234 = vtanh.f32 %v1559_v10  ;;  %1673 = vst [vmem:[#allocation3] sm:$0xff] %v1559_v10 }
 0x4ba   : > { %v1602_v14 = vpop.f32.mrb[28].mxu0  ;;  %v1643_v16 = vpop.f32.mrb[28].mxu1 }
 0x4bb   : > { %v1650_v18 = vadd.f32 %v1949_v13, %v1602_v14  ;;  %v1604_v62 = vpop.f32.mrb[29].mxu0  ;;  %v1645_v41 = vpop.f32.mrb[29].mxu1  ;;  %v1652_v44 = vadd.f32 %v1951_v30, %v1643_v16 }
 0x4bc   : > { %v1651_v34 = vadd.f32 %v1950_v11, %v1604_v62  ;;  %v1606_v25 = vpop.f32.mrb[30].mxu0  ;;  %v1647_v19 = vpop.f32.mrb[30].mxu1  ;;  %v1653_v48 = vadd.f32 %v1952_v45, %v1645_v41 }
 0x4bd   : > { %v2235_v40 = vpop.eup %2234  ;;  %v1654_v23 = vmul.f32 0.5, %v1650_v18  ;;  %v1607_v15 = vpop.f32.mrb[31].mxu0 }
 0x4be   : > { %v1648_v43 = vpop.f32.mrb[31].mxu1  ;;  %v1561_v21 = vmul.f32 %v2235_v40, %v1556_v31  ;;  %v1658_v42 = vmul.f32 0.5, %v1651_v34  ;;  %v1663_v46 = vmul.f32 0.5, %v1653_v48 }
 0x4bf   : > { %2236 = vtanh.f32 %v1654_v23 }
 0x4c0   : > { %1672 = vst [vmem:[#allocation2] sm:$0xff] %v1561_v21  ;;  %2238 = vtanh.f32 %v1658_v42 }
 0x4c1   : > { %2240 = vtanh.f32 %v1652_v44 }
 0x4c2   : > { %2242 = vtanh.f32 %v1663_v46 }
 0x4c9   : > { %v2237_v49 = vpop.eup %2236 }
 0x4ca   : > { %v2239_v50 = vpop.eup %2238  ;;  %v1656_v51 = vmul.f32 0.5, %v2237_v49 }
 0x4cb   : > { %v1660_v52 = vmul.f32 0.5, %v2239_v50  ;;  %v2241_v54 = vpop.eup %2240 }
 0x4cc   : > { %v1657_v53 = vadd.f32 0.5, %v1656_v51  ;;  %v2243_v59 = vpop.eup %2242 }
 0x4cd   : > { %v1661_v55 = vadd.f32 0.5, %v1660_v52  ;;  %v1665_v61 = vmul.f32 0.5, %v2243_v59 }
 0x4ce   : > { %v1668_v56 = vmul.f32 %v2241_v54, %v1657_v53 }
 0x4cf   : > { %v1667_v57 = vmul.f32 %v1661_v55, %v3282_v47  ;;  %v1666_v63 = vadd.f32 0.5, %v1665_v61 }
 0x4d1   : > { %v1669_v58 = vadd.f32 %v1668_v56, %v1667_v57 }
 0x4d3   : > { %2244 = vtanh.f32 %v1669_v58  ;;  %1675 = vst [vmem:[#allocation5] sm:$0xff] %v1669_v58 }
 0x4da   : > { %1678 = sbr.rel (%p3548_p3) target bundleno = 1249 (0x4e1), region = 72 }
 0x4dd   : > { %v2245_v0 = vpop.eup %2244 }
 0x4de   : > { %v1671_v1 = vmul.f32 %v2245_v0, %v1666_v63 }
 0x4e0   : > { %1674 = vst [vmem:[#allocation4] sm:$0xff] %v1671_v1 }
 0x4e1 PF: > { %p1954_p9 = scmp.ne.s32.totalorder %s2605_s9, 2 }
 0x4e2   : > { %1684 = vst [vmem:[#allocation15] sm:$0xff] (!%p1954_p9), %v3170_v26  ;;  %1686 = vst [vmem:[#allocation15 + $0x8] sm:$0xff] (!%p1954_p9), %v3209_v22 }
 0x4e3   : > { %1683 = sbr.rel (%p1954_p9) target bundleno = 1258 (0x4ea), region = 76  ;;  %1687 = vst [vmem:[#allocation16] sm:$0xff] (!%p1954_p9), %v3164_v37  ;;  %1689 = vst [vmem:[#allocation16 + $0x8] sm:$0xff] (!%p1954_p9), %v3194_v24 }
 0x4ea PF: > { %p2017_p11 = scmp.eq.s32.totalorder %s2605_s9, 2  ;;  %s2536_s22 = smov [#allocation16]  }
 0x4eb   : > { %s1709_s15 = sshll.u32 %s2536_s22, 4  ;;  %s2537_s24 = smov [#allocation15]   ;;  %s1710_s15 = int_to_ptr.vmem [resolvable:$true] %s1709_s15 }
 0x4ec   : > { %s1696_s25 = sshll.u32 %s2537_s24, 4  ;;  %s2390_s30 = scalar_lea.vmem %s1710_s15, 256  ;;  %s1697_s25 = int_to_ptr.vmem [resolvable:$true] %s1696_s25 }
 0x4ed   : > { %p2391_p7 = scmp.ne.s32.totalorder %s1710_s15, %s2390_s30  ;;  %p2397_p6 = scmp.lt.s32.totalorder %s1710_s15, %s1710_s15 }
 0x4ee   : > { %p2398_p2 = scmp.lt.s32.totalorder %s2390_s30, %s2390_s30 }
 0x4ef   : > { %p2392_p1 = pnand %p2391_p7, %p2017_p11 }
 0x4f0   : > { %p2399_p4 = por %p2398_p2, %p2397_p6 }
 0x4f1   : > { %p2393_p5 = pneg %p2392_p1 }
 0x4f3   : > { %p2400_p8 = pnand %p2399_p4, %p2393_p5 }
 0x4f5   : > { %2403 = shalt.err (!%p2400_p8)
}
 0x4f6   : > { %s2404_s27 = scalar_lea.hbm %s3400_s7, 256 }
 0x4f7   : > { %p2405_p10 = scmp.ne.s32.totalorder %s3400_s7, %s2404_s27  ;;  %p2410_p0 = scmp.lt.u32.totalorder %s2404_s27, %s3400_s7 }
 0x4f9   : > { %p2406_p12 = pnand %p2405_p10, %p2017_p11 }
 0x4fb   : > { %p2407_p13 = pneg %p2406_p12 }
 0x4fd   : > { %p2412_p3 = pnand %p2410_p0, %p2407_p13 }
 0x4ff   : > { %2415 = shalt.err (!%p2412_p3)
}
 0x500   : > { %s2538_s16 = smov 128   ;;  %s2539_s13 = smov 8  }
 0x501   : > { %1984 = dma.vmem_to_hbm [thread:$0]  (%p2017_p11), %s1710_s15, 256, %s3400_s7, [#allocation17], %s2538_s16, %s2538_s16, %s2539_s13  }
 0x502   : > { %s2416_s12 = scalar_lea.vmem %s1697_s25, 256  ;;  %p2423_p5 = scmp.lt.s32.totalorder %s1697_s25, %s1697_s25 }
 0x503   : > { %p2417_p9 = scmp.ne.s32.totalorder %s1697_s25, %s2416_s12  ;;  %p2424_p6 = scmp.lt.s32.totalorder %s2416_s12, %s2416_s12 }
 0x505   : > { %p2418_p7 = pnand %p2417_p9, %p2017_p11  ;;  %p2425_p2 = por %p2424_p6, %p2423_p5 }
 0x507   : > { %p2419_p1 = pneg %p2418_p7 }
 0x509   : > { %p2426_p4 = pnand %p2425_p2, %p2419_p1 }
 0x50b   : > { %2429 = shalt.err (!%p2426_p4)
}
 0x50c   : > { %s2430_s22 = scalar_lea.hbm %s3399_s6, 256 }
 0x50d   : > { %p2431_p8 = scmp.ne.s32.totalorder %s3399_s6, %s2430_s22  ;;  %p2436_p13 = scmp.lt.u32.totalorder %s2430_s22, %s3399_s6 }
 0x50f   : > { %p2432_p10 = pnand %p2431_p8, %p2017_p11 }
 0x511   : > { %p2433_p12 = pneg %p2432_p10 }
 0x513   : > { %p2438_p0 = pnand %p2436_p13, %p2433_p12 }
 0x515   : > { %2441 = shalt.err (!%p2438_p0)
}
 0x516   : > { %1982 = dma.vmem_to_hbm [thread:$0]  (%p2017_p11), %s1697_s25, 256, %s3399_s6, [#allocation8], %s2538_s16, %s2538_s16, %s2539_s13  }
 0x517   : > { %s2540_s2 = smov [#allocation18]  }
 0x518   : > { %s1723_s19 = sshll.u32 %s2540_s2, 4  ;;  %s1724_s19 = int_to_ptr.vmem [resolvable:$true] %s1723_s19 }
 0x519   : > { %s2442_s26 = scalar_lea.vmem %s1724_s19, 128  ;;  %p2449_p1 = scmp.lt.s32.totalorder %s1724_s19, %s1724_s19 }
 0x51a   : > { %p2443_p3 = scmp.ne.s32.totalorder %s1724_s19, %s2442_s26  ;;  %p2450_p5 = scmp.lt.s32.totalorder %s2442_s26, %s2442_s26 }
 0x51c   : > { %p2444_p9 = pnand %p2443_p3, %p2017_p11  ;;  %p2451_p6 = por %p2450_p5, %p2449_p1 }
 0x51e   : > { %p2445_p7 = pneg %p2444_p9 }
 0x520   : > { %p2452_p2 = pnand %p2451_p6, %p2445_p7 }
 0x522   : > { %2455 = shalt.err (!%p2452_p2)
}
 0x523   : > { %s2456_s11 = scalar_lea.hbm %s3401_s8, 128 }
 0x524   : > { %p2457_p4 = scmp.ne.s32.totalorder %s3401_s8, %s2456_s11  ;;  %p2462_p12 = scmp.lt.u32.totalorder %s2456_s11, %s3401_s8 }
 0x526   : > { %p2458_p8 = pnand %p2457_p4, %p2017_p11 }
 0x528   : > { %p2459_p10 = pneg %p2458_p8 }
 0x52a   : > { %p2464_p13 = pnand %p2462_p12, %p2459_p10 }
 0x52c   : > { %2467 = shalt.err (!%p2464_p13)
}
 0x52d   : > { %1986 = dma.vmem_to_hbm [thread:$0]  (%p2017_p11), %s1724_s19, 128, %s3401_s8, [#allocation17]  }
 0x52e   : > { %2501 = dma.done.wait (%p2017_p11), [#allocation8], 256  }
 0x52f   : > { %2503 = vsyncadd (%p2017_p11), [#allocation8], 4294967040 }
 0x530   : > { %2505 = dma.done.wait (%p2017_p11), [#allocation17], 384  }
 0x531   : > { %2507 = vsyncadd (%p2017_p11), [#allocation17], 4294966912 }
 0x532 PF: > { %p25_p0 = scmp.ge.s32.totalorder %s2708_s17, 5   ;;  %s3550_s27 = smov %s2514_s28 }
 0x533   : > { %s3551_s28 = smov %s2518_s29  ;;  %s3552_s29 = smov %s2718_s21 }
 0x534   : > { %s3553_s30 = smov %s2708_s17  ;;  %27 = sbr.rel (!%p25_p0) target bundleno = 11 (0xb), region = 144 }
 0x53b   :  { %1744 = vsyncpa [#allocation7], 1 }
 0x53c   :  { %1746 = vsyncpa [#allocation7 + $0x1], 1 }
 0x53d   :  { %1747 = vsyncpa [#allocation10], 1 }
 0x53e   :  { %1749 = vsyncpa [#allocation10 + $0x1], 1 }
 0x53f   :  { %1750 = vsyncpa [#allocation13], 1 }
 0x540   :  { %1751 = vsyncpa [#allocation8], 1 }
 0x541   :  { %1753 = vsyncpa [#allocation8 + $0x1], 1 }
 0x542   :  { %1754 = vsyncpa [#allocation17], 1 }

</bundles_post_ra>
